<compile_context>
chip_gen: v7x
topology: tpu7x:2x2x1
jax: 0.10.0
libtpu: 0.0.40
codegen_flags: <defaults>
</compile_context>

<pallas_src>
import jax
import jax.numpy as jnp
import numpy as np
from jax.experimental import pallas as pl
from jax.experimental.pallas import tpu as pltpu

_CompilerParamsCls = getattr(pltpu, "CompilerParams", None) or getattr(
    pltpu, "TPUCompilerParams", None)


# ------------------------------ fused kernel -------------------------------

def _clfnet_kernel(x_ref, m1e_ref, m1o_ref, b1_ref, m2e_ref, m2o_ref, b2_ref,
                   sh1_ref, sh2_ref, sf_ref, wf1_ref, bf1_ref, wf2_ref, bf2_ref,
                   out_ref):
    f32 = jnp.float32

    def mm(a, b):
        return jnp.dot(a, b, preferred_element_type=f32)

    # --- conv1: im2col fused as 3 row-shifted banded matmuls.  The banded weights
    # are split by output-column parity, so max(even, odd) IS the 2x1 half of
    # maxpool1 (relu/+bias commute with max).  Lanes = co*14 + pooled_col.
    x = x_ref[...]                                   # [BT*30, 28]; rows 0/29 per image are zero pad
    n1 = x.shape[0] - 2
    x0, x1, x2 = x[0:n1], x[1:n1 + 1], x[2:n1 + 2]
    c_ev = mm(x0, m1e_ref[0]) + mm(x1, m1e_ref[1]) + mm(x2, m1e_ref[2])
    c_od = mm(x0, m1o_ref[0]) + mm(x1, m1o_ref[1]) + mm(x2, m1o_ref[2])
    aw = jnp.maximum(jnp.maximum(c_ev, c_od) + b1_ref[...], 0.0)   # [BT*30-2, 112]

    # --- 1x2 half of maxpool1: shifted-row max (VPU) + ONE 0/1 selection matmul
    # (also inserts conv2's vertical zero-pad rows for free).
    hm = jnp.maximum(aw[0:n1 - 1], aw[1:n1])
    p1 = mm(sh1_ref[...], hm)                        # [BT*16, 112]

    # --- conv2 (+ fused 2x1 half of maxpool2), lanes = co*7 + pooled_col ----------
    n2 = p1.shape[0] - 2
    q0, q1, q2 = p1[0:n2], p1[1:n2 + 1], p1[2:n2 + 2]
    c_ev = mm(q0, m2e_ref[0]) + mm(q1, m2e_ref[1]) + mm(q2, m2e_ref[2])
    c_od = mm(q0, m2o_ref[0]) + mm(q1, m2o_ref[1]) + mm(q2, m2o_ref[2])
    aw2 = jnp.maximum(jnp.maximum(c_ev, c_od) + b2_ref[...], 0.0)  # [BT*16-2, 112]

    # --- 1x2 half of maxpool2 -----------------------------------------------------
    hm2 = jnp.maximum(aw2[0:n2 - 1], aw2[1:n2])
    p2 = mm(sh2_ref[...], hm2)                       # [BT*7, 112], lanes = co*7 + j

    # --- fc1 + ReLU: PyTorch's NCHW flatten order is folded into permuted weights --
    acc = mm(mm(sf_ref[0], p2), wf1_ref[0])          # [BT, 128]
    for i in range(1, 7):
        acc = acc + mm(mm(sf_ref[i], p2), wf1_ref[i])
    h = jnp.maximum(acc + bf1_ref[...], 0.0)         # cols >= 75 stay 0

    # TODO(synk): nn.Dropout(0.2) is identity at inference; training-mode RNG mask
    # is not implemented.

    # --- fc2 + ReLU (the reference ClfNet applies ReLU to the fc2 logits too) -----
    o = jnp.maximum(mm(h, wf2_ref[...]) + bf2_ref[...], 0.0)  # [BT, 128] lane-dense store
    out_ref[...] = o.astype(out_ref.dtype)


# -------------------------- weight / selector packing ----------------------

def _pack_constants(params, bt):
    f32 = jnp.float32
    hi = jax.lax.Precision.HIGHEST
    w1 = params["conv1_w"].astype(f32)          # [8, 1, 3, 3]   (PyTorch OIHW)
    b1 = params["conv1_b"].astype(f32)
    w2 = params["conv2_w"].astype(f32)          # [16, 8, 3, 3]
    b2 = params["conv2_b"].astype(f32)
    wf1 = params["fc1_w"].astype(f32)           # [75, 784]      (PyTorch [out, in])
    bf1 = params["fc1_b"].astype(f32)
    wf2 = params["fc2_w"].astype(f32)           # [10, 75]
    bf2 = params["fc2_b"].astype(f32)

    # Banded conv->matmul weights: M[kh][w, (co, j)] = w[co, ci, kh, w - j + 1]
    # (taps outside [0, W) dropped == horizontal zero padding), split by output-
    # column parity so max(even, odd) implements the 2x1 pool half in the kernel.
    t1 = np.stack([np.eye(28, k=1 - kw, dtype=np.float32) for kw in range(3)])
    m1 = jnp.einsum("chk,kwj->hwcj", w1[:, 0], jnp.asarray(t1),
                    precision=hi)                               # [3, 28, 8, 28]
    m1e = m1[..., 0::2].reshape(3, 28, 112)
    m1o = m1[..., 1::2].reshape(3, 28, 112)
    t2 = np.stack([np.eye(14, k=1 - kw, dtype=np.float32) for kw in range(3)])
    m2 = jnp.einsum("cihk,kwj->hiwcj", w2, jnp.asarray(t2),
                    precision=hi).reshape(3, 112, 16, 14)       # [3, ci*14+w, co, j]
    m2e = m2[..., 0::2].reshape(3, 112, 112)
    m2o = m2[..., 1::2].reshape(3, 112, 112)
    b1t = jnp.repeat(b1, 14).reshape(1, 112)
    b2t = jnp.repeat(b2, 7).reshape(1, 112)

    # 0/1 row-selection matrices for the 1x2 pool halves (single matmul each:
    # the pairwise max is done beforehand with a shifted-row elementwise max).
    # sh1 also inserts conv2's vertical zero-pad rows (local rows 0 and 15).
    bb = np.arange(bt)[:, None]
    r14 = np.arange(14)[None, :]
    r7 = np.arange(7)[None, :]

    sh1 = np.zeros((bt * 16, bt * 30 - 3), np.float32)
    sh1[(bb * 16 + 1 + r14).ravel(), (bb * 30 + 2 * r14).ravel()] = 1.0
    sh2 = np.zeros((bt * 7, bt * 16 - 3), np.float32)
    sh2[(bb * 7 + r7).ravel(), (bb * 16 + 2 * r7).ravel()] = 1.0

    sf = np.zeros((7, bt, bt * 7), np.float32)          # picks spatial row i of each image
    for i in range(7):
        sf[i, np.arange(bt), np.arange(bt) * 7 + i] = 1.0

    # fc1 weights permuted so the kernel's (i', co, j') layout matches PyTorch's
    # x.view(B, -1) order (co, i', j'); N padded to 128 lanes (zeros -> relu(0)=0).
    wf1p = jnp.transpose(wf1.reshape(75, 16, 7, 7), (2, 1, 3, 0)).reshape(7, 112, 75)
    wf1p = jnp.pad(wf1p, ((0, 0), (0, 0), (0, 53)))
    bf1p = jnp.pad(bf1, (0, 53)).reshape(1, 128)
    wf2p = jnp.pad(wf2.T, ((0, 53), (0, 118)))          # [128, 128]
    bf2p = jnp.pad(bf2, (0, 118)).reshape(1, 128)

    return (m1e, m1o, b1t, m2e, m2o, b2t,
            jnp.asarray(sh1), jnp.asarray(sh2), jnp.asarray(sf),
            wf1p, bf1p, wf2p, bf2p)


# ------------------------------- forward pass ------------------------------

def clfnet_forward(params, x_nchw):
    """Matches ClfNet.forward. x: [B, 1, 28, 28] float32 (NCHW). Returns [B, 10]."""
    B, C, H, W = x_nchw.shape
    assert (C, H, W) == (1, 28, 28), "fc1 = Linear(7*7*16, 75) forces 28x28 x 1ch input"

    # Batch tile: multiples of 8 keep every block (8,128)-aligned; tiny batches use one block.
    if B % 16 == 0:
        bt = 16
    elif B % 8 == 0:
        bt = 8
    elif B <= 8:
        bt = B
    else:
        bt = 8
    b_pad = -(-B // bt) * bt
    x32 = x_nchw.astype(jnp.float32)
    if b_pad != B:
        x32 = jnp.pad(x32, ((0, b_pad - B), (0, 0), (0, 0), (0, 0)))

    consts = _pack_constants(params, bt)
    # Per-image vertical zero padding (rows 0 / 29); horizontal padding is in the banded weights.
    xv = jnp.pad(x32[:, 0], ((0, 0), (1, 1), (0, 0))).reshape(b_pad * 30, 28)

    def const_spec(a):
        r = a.ndim
        return pl.BlockSpec(a.shape, lambda g, _r=r: (0,) * _r)

    extra = {}
    if _CompilerParamsCls is not None:
        extra["compiler_params"] = _CompilerParamsCls(dimension_semantics=("parallel",))

    out = pl.pallas_call(
        _clfnet_kernel,
        out_shape=jax.ShapeDtypeStruct((b_pad, 128), jnp.float32),
        grid=(b_pad // bt,),
        in_specs=[pl.BlockSpec((bt * 30, 28), lambda g: (g, 0))]
                 + [const_spec(a) for a in consts],
        out_specs=pl.BlockSpec((bt, 128), lambda g: (g, 0)),
        **extra,
    )(xv, *consts)
    return out[:B, :10]


# ------------------------- params + pure-JAX reference ---------------------

def init_params(key):
    """Deterministic init with the exact parameter shapes of ClfNet.__init__ (PyTorch layout)."""
    ks = jax.random.split(key, 8)

    def u(k, shape, fan_in):
        bound = 1.0 / float(fan_in) ** 0.5
        return jax.random.uniform(k, shape, jnp.float32, -bound, bound)

    return {
        "conv1_w": u(ks[0], (8, 1, 3, 3), 9),
        "conv1_b": u(ks[1], (8,), 9),
        "conv2_w": u(ks[2], (16, 8, 3, 3), 72),
        "conv2_b": u(ks[3], (16,), 72),
        "fc1_w": u(ks[4], (75, 7 * 7 * 16), 7 * 7 * 16),
        "fc1_b": u(ks[5], (75,), 7 * 7 * 16),
        "fc2_w": u(ks[6], (10, 75), 75),
        "fc2_b": u(ks[7], (10,), 75),
    }


def clfnet_reference(params, x):
    """Independent XLA reference (lax.conv / reduce_window) mirroring ClfNet.forward."""
    hi = jax.lax.Precision.HIGHEST
    dn = ("NCHW", "OIHW", "NCHW")
    y = jax.lax.conv_general_dilated(x.astype(jnp.float32), params["conv1_w"],
                                     (1, 1), ((1, 1), (1, 1)),
                                     dimension_numbers=dn, precision=hi)
    y = jax.nn.relu(y + params["conv1_b"].reshape(1, -1, 1, 1))
    y = jax.lax.reduce_window(y, -jnp.inf, jax.lax.max, (1, 1, 2, 2), (1, 1, 2, 2), "VALID")
    y = jax.lax.conv_general_dilated(y, params["conv2_w"], (1, 1), ((1, 1), (1, 1)),
                                     dimension_numbers=dn, precision=hi)
    y = jax.nn.relu(y + params["conv2_b"].reshape(1, -1, 1, 1))
    y = jax.lax.reduce_window(y, -jnp.inf, jax.lax.max, (1, 1, 2, 2), (1, 1, 2, 2), "VALID")
    y = y.reshape(y.shape[0], -1)                                   # NCHW flatten
    y = jax.nn.relu(jnp.dot(y, params["fc1_w"].T, precision=hi) + params["fc1_b"])
    y = jax.nn.relu(jnp.dot(y, params["fc2_w"].T, precision=hi) + params["fc2_b"])
    return y


if __name__ == "__main__":
    key = jax.random.PRNGKey(0)
    pkey, xkey = jax.random.split(key)
    params = init_params(pkey)
    x = jax.random.normal(xkey, (2, 1, 28, 28), dtype=jnp.float32)

    fwd = jax.jit(clfnet_forward)
    out = jax.block_until_ready(fwd(params, x))
    assert out.shape == (2, 10)
    assert bool(jnp.all(out >= 0.0))            # final ReLU

    # Tolerance is sized to absorb MXU f32-pass accumulation differences; any layout /
    # indexing bug would produce O(1) errors.
    ref = jax.block_until_ready(clfnet_reference(params, x))
    assert bool(jnp.allclose(out, ref, atol=1e-2, rtol=1e-2)), float(jnp.max(jnp.abs(out - ref)))

    print("KERNEL_OK")
</pallas_src>

<mosaic_0001>
module attributes {stable_mosaic.version = 11 : i64} {
  func.func @_clfnet_kernel(%arg0: i32, %arg1: memref<60x28xf32, #tpu.memory_space<vmem>>, %arg2: memref<3x28x112xf32, #tpu.memory_space<vmem>>, %arg3: memref<3x28x112xf32, #tpu.memory_space<vmem>>, %arg4: memref<1x112xf32, #tpu.memory_space<vmem>>, %arg5: memref<3x112x112xf32, #tpu.memory_space<vmem>>, %arg6: memref<3x112x112xf32, #tpu.memory_space<vmem>>, %arg7: memref<1x112xf32, #tpu.memory_space<vmem>>, %arg8: memref<32x57xf32, #tpu.memory_space<vmem>>, %arg9: memref<14x29xf32, #tpu.memory_space<vmem>>, %arg10: memref<7x2x14xf32, #tpu.memory_space<vmem>>, %arg11: memref<7x112x128xf32, #tpu.memory_space<vmem>>, %arg12: memref<1x128xf32, #tpu.memory_space<vmem>>, %arg13: memref<128x128xf32, #tpu.memory_space<vmem>>, %arg14: memref<1x128xf32, #tpu.memory_space<vmem>>, %arg15: memref<2x128xf32, #tpu.memory_space<vmem>>) attributes {dimension_semantics = [#tpu.dimension_semantics<parallel>], iteration_bounds = array<i64: 1>, scalar_prefetch = 0 : i64, scratch_operands = 0 : i64, tpu.core_type = #tpu.core_type<tc>, window_params = [{transform_indices = @transform_0, window_bounds = array<i64: 60, 28>}, {pipeline_mode = #tpu.pipeline_mode<synchronous>, transform_indices = @transform_1, window_bounds = array<i64: 3, 28, 112>}, {pipeline_mode = #tpu.pipeline_mode<synchronous>, transform_indices = @transform_2, window_bounds = array<i64: 3, 28, 112>}, {pipeline_mode = #tpu.pipeline_mode<synchronous>, transform_indices = @transform_3, window_bounds = array<i64: 1, 112>}, {pipeline_mode = #tpu.pipeline_mode<synchronous>, transform_indices = @transform_4, window_bounds = array<i64: 3, 112, 112>}, {pipeline_mode = #tpu.pipeline_mode<synchronous>, transform_indices = @transform_5, window_bounds = array<i64: 3, 112, 112>}, {pipeline_mode = #tpu.pipeline_mode<synchronous>, transform_indices = @transform_6, window_bounds = array<i64: 1, 112>}, {pipeline_mode = #tpu.pipeline_mode<synchronous>, transform_indices = @transform_7, window_bounds = array<i64: 32, 57>}, {pipeline_mode = #tpu.pipeline_mode<synchronous>, transform_indices = @transform_8, window_bounds = array<i64: 14, 29>}, {pipeline_mode = #tpu.pipeline_mode<synchronous>, transform_indices = @transform_9, window_bounds = array<i64: 7, 2, 14>}, {pipeline_mode = #tpu.pipeline_mode<synchronous>, transform_indices = @transform_10, window_bounds = array<i64: 7, 112, 128>}, {pipeline_mode = #tpu.pipeline_mode<synchronous>, transform_indices = @transform_11, window_bounds = array<i64: 1, 128>}, {pipeline_mode = #tpu.pipeline_mode<synchronous>, transform_indices = @transform_12, window_bounds = array<i64: 128, 128>}, {pipeline_mode = #tpu.pipeline_mode<synchronous>, transform_indices = @transform_13, window_bounds = array<i64: 1, 128>}, {transform_indices = @transform_14, window_bounds = array<i64: 2, 128>}]} {
    %c0 = arith.constant 0 : index
    %c0_0 = arith.constant 0 : index
    %0 = vector.load %arg1[%c0, %c0_0] : memref<60x28xf32, #tpu.memory_space<vmem>>, vector<60x28xf32>
    %1 = vector.extract_strided_slice %0 {offsets = [0, 0], sizes = [58, 28], strides = [1, 1]} : vector<60x28xf32> to vector<58x28xf32>
    %2 = vector.extract_strided_slice %0 {offsets = [1, 0], sizes = [58, 28], strides = [1, 1]} : vector<60x28xf32> to vector<58x28xf32>
    %3 = vector.extract_strided_slice %0 {offsets = [2, 0], sizes = [58, 28], strides = [1, 1]} : vector<60x28xf32> to vector<58x28xf32>
    %c0_1 = arith.constant 0 : index
    %c0_2 = arith.constant 0 : index
    %c0_3 = arith.constant 0 : index
    %4 = vector.load %arg2[%c0_1, %c0_2, %c0_3] : memref<3x28x112xf32, #tpu.memory_space<vmem>>, vector<1x28x112xf32>
    %5 = vector.shape_cast %4 : vector<1x28x112xf32> to vector<28x112xf32>
    %cst = arith.constant dense<0.000000e+00> : vector<58x112xf32>
    %6 = tpu.matmul %1, %5, %cst {dimension_numbers = #tpu.dot_dimension_numbers<[1], [0], [0], [1], [0, 0, 1, 1], [], []>} : vector<58x28xf32>, vector<28x112xf32>, vector<58x112xf32> -> vector<58x112xf32>
    %c1 = arith.constant 1 : index
    %c0_4 = arith.constant 0 : index
    %c0_5 = arith.constant 0 : index
    %7 = vector.load %arg2[%c1, %c0_4, %c0_5] : memref<3x28x112xf32, #tpu.memory_space<vmem>>, vector<1x28x112xf32>
    %8 = vector.shape_cast %7 : vector<1x28x112xf32> to vector<28x112xf32>
    %cst_6 = arith.constant dense<0.000000e+00> : vector<58x112xf32>
    %9 = tpu.matmul %2, %8, %cst_6 {dimension_numbers = #tpu.dot_dimension_numbers<[1], [0], [0], [1], [0, 0, 1, 1], [], []>} : vector<58x28xf32>, vector<28x112xf32>, vector<58x112xf32> -> vector<58x112xf32>
    %10 = arith.addf %6, %9 : vector<58x112xf32>
    %c2 = arith.constant 2 : index
    %c0_7 = arith.constant 0 : index
    %c0_8 = arith.constant 0 : index
    %11 = vector.load %arg2[%c2, %c0_7, %c0_8] : memref<3x28x112xf32, #tpu.memory_space<vmem>>, vector<1x28x112xf32>
    %12 = vector.shape_cast %11 : vector<1x28x112xf32> to vector<28x112xf32>
    %cst_9 = arith.constant dense<0.000000e+00> : vector<58x112xf32>
    %13 = tpu.matmul %3, %12, %cst_9 {dimension_numbers = #tpu.dot_dimension_numbers<[1], [0], [0], [1], [0, 0, 1, 1], [], []>} : vector<58x28xf32>, vector<28x112xf32>, vector<58x112xf32> -> vector<58x112xf32>
    %14 = arith.addf %10, %13 : vector<58x112xf32>
    %c0_10 = arith.constant 0 : index
    %c0_11 = arith.constant 0 : index
    %c0_12 = arith.constant 0 : index
    %15 = vector.load %arg3[%c0_10, %c0_11, %c0_12] : memref<3x28x112xf32, #tpu.memory_space<vmem>>, vector<1x28x112xf32>
    %16 = vector.shape_cast %15 : vector<1x28x112xf32> to vector<28x112xf32>
    %cst_13 = arith.constant dense<0.000000e+00> : vector<58x112xf32>
    %17 = tpu.matmul %1, %16, %cst_13 {dimension_numbers = #tpu.dot_dimension_numbers<[1], [0], [0], [1], [0, 0, 1, 1], [], []>} : vector<58x28xf32>, vector<28x112xf32>, vector<58x112xf32> -> vector<58x112xf32>
    %c1_14 = arith.constant 1 : index
    %c0_15 = arith.constant 0 : index
    %c0_16 = arith.constant 0 : index
    %18 = vector.load %arg3[%c1_14, %c0_15, %c0_16] : memref<3x28x112xf32, #tpu.memory_space<vmem>>, vector<1x28x112xf32>
    %19 = vector.shape_cast %18 : vector<1x28x112xf32> to vector<28x112xf32>
    %cst_17 = arith.constant dense<0.000000e+00> : vector<58x112xf32>
    %20 = tpu.matmul %2, %19, %cst_17 {dimension_numbers = #tpu.dot_dimension_numbers<[1], [0], [0], [1], [0, 0, 1, 1], [], []>} : vector<58x28xf32>, vector<28x112xf32>, vector<58x112xf32> -> vector<58x112xf32>
    %21 = arith.addf %17, %20 : vector<58x112xf32>
    %c2_18 = arith.constant 2 : index
    %c0_19 = arith.constant 0 : index
    %c0_20 = arith.constant 0 : index
    %22 = vector.load %arg3[%c2_18, %c0_19, %c0_20] : memref<3x28x112xf32, #tpu.memory_space<vmem>>, vector<1x28x112xf32>
    %23 = vector.shape_cast %22 : vector<1x28x112xf32> to vector<28x112xf32>
    %cst_21 = arith.constant dense<0.000000e+00> : vector<58x112xf32>
    %24 = tpu.matmul %3, %23, %cst_21 {dimension_numbers = #tpu.dot_dimension_numbers<[1], [0], [0], [1], [0, 0, 1, 1], [], []>} : vector<58x28xf32>, vector<28x112xf32>, vector<58x112xf32> -> vector<58x112xf32>
    %25 = arith.addf %21, %24 : vector<58x112xf32>
    %26 = arith.maximumf %14, %25 : vector<58x112xf32>
    %c0_22 = arith.constant 0 : index
    %c0_23 = arith.constant 0 : index
    %27 = vector.load %arg4[%c0_22, %c0_23] : memref<1x112xf32, #tpu.memory_space<vmem>>, vector<1x112xf32>
    %28 = vector.broadcast %27 : vector<1x112xf32> to vector<58x112xf32>
    %29 = arith.addf %26, %28 : vector<58x112xf32>
    %cst_24 = arith.constant 0.000000e+00 : f32
    %30 = vector.broadcast %cst_24 : f32 to vector<58x112xf32>
    %31 = arith.maximumf %29, %30 : vector<58x112xf32>
    %32 = vector.extract_strided_slice %31 {offsets = [0, 0], sizes = [57, 112], strides = [1, 1]} : vector<58x112xf32> to vector<57x112xf32>
    %33 = vector.extract_strided_slice %31 {offsets = [1, 0], sizes = [57, 112], strides = [1, 1]} : vector<58x112xf32> to vector<57x112xf32>
    %34 = arith.maximumf %32, %33 : vector<57x112xf32>
    %c0_25 = arith.constant 0 : index
    %c0_26 = arith.constant 0 : index
    %35 = vector.load %arg8[%c0_25, %c0_26] : memref<32x57xf32, #tpu.memory_space<vmem>>, vector<32x57xf32>
    %cst_27 = arith.constant dense<0.000000e+00> : vector<32x112xf32>
    %36 = tpu.matmul %35, %34, %cst_27 {dimension_numbers = #tpu.dot_dimension_numbers<[1], [0], [0], [1], [0, 0, 1, 1], [], []>} : vector<32x57xf32>, vector<57x112xf32>, vector<32x112xf32> -> vector<32x112xf32>
    %37 = vector.extract_strided_slice %36 {offsets = [0, 0], sizes = [30, 112], strides = [1, 1]} : vector<32x112xf32> to vector<30x112xf32>
    %38 = vector.extract_strided_slice %36 {offsets = [1, 0], sizes = [30, 112], strides = [1, 1]} : vector<32x112xf32> to vector<30x112xf32>
    %39 = vector.extract_strided_slice %36 {offsets = [2, 0], sizes = [30, 112], strides = [1, 1]} : vector<32x112xf32> to vector<30x112xf32>
    %c0_28 = arith.constant 0 : index
    %c0_29 = arith.constant 0 : index
    %c0_30 = arith.constant 0 : index
    %40 = vector.load %arg5[%c0_28, %c0_29, %c0_30] : memref<3x112x112xf32, #tpu.memory_space<vmem>>, vector<1x112x112xf32>
    %41 = vector.shape_cast %40 : vector<1x112x112xf32> to vector<112x112xf32>
    %cst_31 = arith.constant dense<0.000000e+00> : vector<30x112xf32>
    %42 = tpu.matmul %37, %41, %cst_31 {dimension_numbers = #tpu.dot_dimension_numbers<[1], [0], [0], [1], [0, 0, 1, 1], [], []>} : vector<30x112xf32>, vector<112x112xf32>, vector<30x112xf32> -> vector<30x112xf32>
    %c1_32 = arith.constant 1 : index
    %c0_33 = arith.constant 0 : index
    %c0_34 = arith.constant 0 : index
    %43 = vector.load %arg5[%c1_32, %c0_33, %c0_34] : memref<3x112x112xf32, #tpu.memory_space<vmem>>, vector<1x112x112xf32>
    %44 = vector.shape_cast %43 : vector<1x112x112xf32> to vector<112x112xf32>
    %cst_35 = arith.constant dense<0.000000e+00> : vector<30x112xf32>
    %45 = tpu.matmul %38, %44, %cst_35 {dimension_numbers = #tpu.dot_dimension_numbers<[1], [0], [0], [1], [0, 0, 1, 1], [], []>} : vector<30x112xf32>, vector<112x112xf32>, vector<30x112xf32> -> vector<30x112xf32>
    %46 = arith.addf %42, %45 : vector<30x112xf32>
    %c2_36 = arith.constant 2 : index
    %c0_37 = arith.constant 0 : index
    %c0_38 = arith.constant 0 : index
    %47 = vector.load %arg5[%c2_36, %c0_37, %c0_38] : memref<3x112x112xf32, #tpu.memory_space<vmem>>, vector<1x112x112xf32>
    %48 = vector.shape_cast %47 : vector<1x112x112xf32> to vector<112x112xf32>
    %cst_39 = arith.constant dense<0.000000e+00> : vector<30x112xf32>
    %49 = tpu.matmul %39, %48, %cst_39 {dimension_numbers = #tpu.dot_dimension_numbers<[1], [0], [0], [1], [0, 0, 1, 1], [], []>} : vector<30x112xf32>, vector<112x112xf32>, vector<30x112xf32> -> vector<30x112xf32>
    %50 = arith.addf %46, %49 : vector<30x112xf32>
    %c0_40 = arith.constant 0 : index
    %c0_41 = arith.constant 0 : index
    %c0_42 = arith.constant 0 : index
    %51 = vector.load %arg6[%c0_40, %c0_41, %c0_42] : memref<3x112x112xf32, #tpu.memory_space<vmem>>, vector<1x112x112xf32>
    %52 = vector.shape_cast %51 : vector<1x112x112xf32> to vector<112x112xf32>
    %cst_43 = arith.constant dense<0.000000e+00> : vector<30x112xf32>
    %53 = tpu.matmul %37, %52, %cst_43 {dimension_numbers = #tpu.dot_dimension_numbers<[1], [0], [0], [1], [0, 0, 1, 1], [], []>} : vector<30x112xf32>, vector<112x112xf32>, vector<30x112xf32> -> vector<30x112xf32>
    %c1_44 = arith.constant 1 : index
    %c0_45 = arith.constant 0 : index
    %c0_46 = arith.constant 0 : index
    %54 = vector.load %arg6[%c1_44, %c0_45, %c0_46] : memref<3x112x112xf32, #tpu.memory_space<vmem>>, vector<1x112x112xf32>
    %55 = vector.shape_cast %54 : vector<1x112x112xf32> to vector<112x112xf32>
    %cst_47 = arith.constant dense<0.000000e+00> : vector<30x112xf32>
    %56 = tpu.matmul %38, %55, %cst_47 {dimension_numbers = #tpu.dot_dimension_numbers<[1], [0], [0], [1], [0, 0, 1, 1], [], []>} : vector<30x112xf32>, vector<112x112xf32>, vector<30x112xf32> -> vector<30x112xf32>
    %57 = arith.addf %53, %56 : vector<30x112xf32>
    %c2_48 = arith.constant 2 : index
    %c0_49 = arith.constant 0 : index
    %c0_50 = arith.constant 0 : index
    %58 = vector.load %arg6[%c2_48, %c0_49, %c0_50] : memref<3x112x112xf32, #tpu.memory_space<vmem>>, vector<1x112x112xf32>
    %59 = vector.shape_cast %58 : vector<1x112x112xf32> to vector<112x112xf32>
    %cst_51 = arith.constant dense<0.000000e+00> : vector<30x112xf32>
    %60 = tpu.matmul %39, %59, %cst_51 {dimension_numbers = #tpu.dot_dimension_numbers<[1], [0], [0], [1], [0, 0, 1, 1], [], []>} : vector<30x112xf32>, vector<112x112xf32>, vector<30x112xf32> -> vector<30x112xf32>
    %61 = arith.addf %57, %60 : vector<30x112xf32>
    %62 = arith.maximumf %50, %61 : vector<30x112xf32>
    %c0_52 = arith.constant 0 : index
    %c0_53 = arith.constant 0 : index
    %63 = vector.load %arg7[%c0_52, %c0_53] : memref<1x112xf32, #tpu.memory_space<vmem>>, vector<1x112xf32>
    %64 = vector.broadcast %63 : vector<1x112xf32> to vector<30x112xf32>
    %65 = arith.addf %62, %64 : vector<30x112xf32>
    %cst_54 = arith.constant 0.000000e+00 : f32
    %66 = vector.broadcast %cst_54 : f32 to vector<30x112xf32>
    %67 = arith.maximumf %65, %66 : vector<30x112xf32>
    %68 = vector.extract_strided_slice %67 {offsets = [0, 0], sizes = [29, 112], strides = [1, 1]} : vector<30x112xf32> to vector<29x112xf32>
    %69 = vector.extract_strided_slice %67 {offsets = [1, 0], sizes = [29, 112], strides = [1, 1]} : vector<30x112xf32> to vector<29x112xf32>
    %70 = arith.maximumf %68, %69 : vector<29x112xf32>
    %c0_55 = arith.constant 0 : index
    %c0_56 = arith.constant 0 : index
    %71 = vector.load %arg9[%c0_55, %c0_56] : memref<14x29xf32, #tpu.memory_space<vmem>>, vector<14x29xf32>
    %cst_57 = arith.constant dense<0.000000e+00> : vector<14x112xf32>
    %72 = tpu.matmul %71, %70, %cst_57 {dimension_numbers = #tpu.dot_dimension_numbers<[1], [0], [0], [1], [0, 0, 1, 1], [], []>} : vector<14x29xf32>, vector<29x112xf32>, vector<14x112xf32> -> vector<14x112xf32>
    %c0_58 = arith.constant 0 : index
    %c0_59 = arith.constant 0 : index
    %c0_60 = arith.constant 0 : index
    %73 = vector.load %arg10[%c0_58, %c0_59, %c0_60] : memref<7x2x14xf32, #tpu.memory_space<vmem>>, vector<1x2x14xf32>
    %74 = vector.shape_cast %73 : vector<1x2x14xf32> to vector<2x14xf32>
    %cst_61 = arith.constant dense<0.000000e+00> : vector<2x112xf32>
    %75 = tpu.matmul %74, %72, %cst_61 {dimension_numbers = #tpu.dot_dimension_numbers<[1], [0], [0], [1], [0, 0, 1, 1], [], []>} : vector<2x14xf32>, vector<14x112xf32>, vector<2x112xf32> -> vector<2x112xf32>
    %c0_62 = arith.constant 0 : index
    %c0_63 = arith.constant 0 : index
    %c0_64 = arith.constant 0 : index
    %76 = vector.load %arg11[%c0_62, %c0_63, %c0_64] : memref<7x112x128xf32, #tpu.memory_space<vmem>>, vector<1x112x128xf32>
    %77 = vector.shape_cast %76 : vector<1x112x128xf32> to vector<112x128xf32>
    %cst_65 = arith.constant dense<0.000000e+00> : vector<2x128xf32>
    %78 = tpu.matmul %75, %77, %cst_65 {dimension_numbers = #tpu.dot_dimension_numbers<[1], [0], [0], [1], [0, 0, 1, 1], [], []>} : vector<2x112xf32>, vector<112x128xf32>, vector<2x128xf32> -> vector<2x128xf32>
    %c1_66 = arith.constant 1 : index
    %c0_67 = arith.constant 0 : index
    %c0_68 = arith.constant 0 : index
    %79 = vector.load %arg10[%c1_66, %c0_67, %c0_68] : memref<7x2x14xf32, #tpu.memory_space<vmem>>, vector<1x2x14xf32>
    %80 = vector.shape_cast %79 : vector<1x2x14xf32> to vector<2x14xf32>
    %cst_69 = arith.constant dense<0.000000e+00> : vector<2x112xf32>
    %81 = tpu.matmul %80, %72, %cst_69 {dimension_numbers = #tpu.dot_dimension_numbers<[1], [0], [0], [1], [0, 0, 1, 1], [], []>} : vector<2x14xf32>, vector<14x112xf32>, vector<2x112xf32> -> vector<2x112xf32>
    %c1_70 = arith.constant 1 : index
    %c0_71 = arith.constant 0 : index
    %c0_72 = arith.constant 0 : index
    %82 = vector.load %arg11[%c1_70, %c0_71, %c0_72] : memref<7x112x128xf32, #tpu.memory_space<vmem>>, vector<1x112x128xf32>
    %83 = vector.shape_cast %82 : vector<1x112x128xf32> to vector<112x128xf32>
    %cst_73 = arith.constant dense<0.000000e+00> : vector<2x128xf32>
    %84 = tpu.matmul %81, %83, %cst_73 {dimension_numbers = #tpu.dot_dimension_numbers<[1], [0], [0], [1], [0, 0, 1, 1], [], []>} : vector<2x112xf32>, vector<112x128xf32>, vector<2x128xf32> -> vector<2x128xf32>
    %85 = arith.addf %78, %84 : vector<2x128xf32>
    %c2_74 = arith.constant 2 : index
    %c0_75 = arith.constant 0 : index
    %c0_76 = arith.constant 0 : index
    %86 = vector.load %arg10[%c2_74, %c0_75, %c0_76] : memref<7x2x14xf32, #tpu.memory_space<vmem>>, vector<1x2x14xf32>
    %87 = vector.shape_cast %86 : vector<1x2x14xf32> to vector<2x14xf32>
    %cst_77 = arith.constant dense<0.000000e+00> : vector<2x112xf32>
    %88 = tpu.matmul %87, %72, %cst_77 {dimension_numbers = #tpu.dot_dimension_numbers<[1], [0], [0], [1], [0, 0, 1, 1], [], []>} : vector<2x14xf32>, vector<14x112xf32>, vector<2x112xf32> -> vector<2x112xf32>
    %c2_78 = arith.constant 2 : index
    %c0_79 = arith.constant 0 : index
    %c0_80 = arith.constant 0 : index
    %89 = vector.load %arg11[%c2_78, %c0_79, %c0_80] : memref<7x112x128xf32, #tpu.memory_space<vmem>>, vector<1x112x128xf32>
    %90 = vector.shape_cast %89 : vector<1x112x128xf32> to vector<112x128xf32>
    %cst_81 = arith.constant dense<0.000000e+00> : vector<2x128xf32>
    %91 = tpu.matmul %88, %90, %cst_81 {dimension_numbers = #tpu.dot_dimension_numbers<[1], [0], [0], [1], [0, 0, 1, 1], [], []>} : vector<2x112xf32>, vector<112x128xf32>, vector<2x128xf32> -> vector<2x128xf32>
    %92 = arith.addf %85, %91 : vector<2x128xf32>
    %c3 = arith.constant 3 : index
    %c0_82 = arith.constant 0 : index
    %c0_83 = arith.constant 0 : index
    %93 = vector.load %arg10[%c3, %c0_82, %c0_83] : memref<7x2x14xf32, #tpu.memory_space<vmem>>, vector<1x2x14xf32>
    %94 = vector.shape_cast %93 : vector<1x2x14xf32> to vector<2x14xf32>
    %cst_84 = arith.constant dense<0.000000e+00> : vector<2x112xf32>
    %95 = tpu.matmul %94, %72, %cst_84 {dimension_numbers = #tpu.dot_dimension_numbers<[1], [0], [0], [1], [0, 0, 1, 1], [], []>} : vector<2x14xf32>, vector<14x112xf32>, vector<2x112xf32> -> vector<2x112xf32>
    %c3_85 = arith.constant 3 : index
    %c0_86 = arith.constant 0 : index
    %c0_87 = arith.constant 0 : index
    %96 = vector.load %arg11[%c3_85, %c0_86, %c0_87] : memref<7x112x128xf32, #tpu.memory_space<vmem>>, vector<1x112x128xf32>
    %97 = vector.shape_cast %96 : vector<1x112x128xf32> to vector<112x128xf32>
    %cst_88 = arith.constant dense<0.000000e+00> : vector<2x128xf32>
    %98 = tpu.matmul %95, %97, %cst_88 {dimension_numbers = #tpu.dot_dimension_numbers<[1], [0], [0], [1], [0, 0, 1, 1], [], []>} : vector<2x112xf32>, vector<112x128xf32>, vector<2x128xf32> -> vector<2x128xf32>
    %99 = arith.addf %92, %98 : vector<2x128xf32>
    %c4 = arith.constant 4 : index
    %c0_89 = arith.constant 0 : index
    %c0_90 = arith.constant 0 : index
    %100 = vector.load %arg10[%c4, %c0_89, %c0_90] : memref<7x2x14xf32, #tpu.memory_space<vmem>>, vector<1x2x14xf32>
    %101 = vector.shape_cast %100 : vector<1x2x14xf32> to vector<2x14xf32>
    %cst_91 = arith.constant dense<0.000000e+00> : vector<2x112xf32>
    %102 = tpu.matmul %101, %72, %cst_91 {dimension_numbers = #tpu.dot_dimension_numbers<[1], [0], [0], [1], [0, 0, 1, 1], [], []>} : vector<2x14xf32>, vector<14x112xf32>, vector<2x112xf32> -> vector<2x112xf32>
    %c4_92 = arith.constant 4 : index
    %c0_93 = arith.constant 0 : index
    %c0_94 = arith.constant 0 : index
    %103 = vector.load %arg11[%c4_92, %c0_93, %c0_94] : memref<7x112x128xf32, #tpu.memory_space<vmem>>, vector<1x112x128xf32>
    %104 = vector.shape_cast %103 : vector<1x112x128xf32> to vector<112x128xf32>
    %cst_95 = arith.constant dense<0.000000e+00> : vector<2x128xf32>
    %105 = tpu.matmul %102, %104, %cst_95 {dimension_numbers = #tpu.dot_dimension_numbers<[1], [0], [0], [1], [0, 0, 1, 1], [], []>} : vector<2x112xf32>, vector<112x128xf32>, vector<2x128xf32> -> vector<2x128xf32>
    %106 = arith.addf %99, %105 : vector<2x128xf32>
    %c5 = arith.constant 5 : index
    %c0_96 = arith.constant 0 : index
    %c0_97 = arith.constant 0 : index
    %107 = vector.load %arg10[%c5, %c0_96, %c0_97] : memref<7x2x14xf32, #tpu.memory_space<vmem>>, vector<1x2x14xf32>
    %108 = vector.shape_cast %107 : vector<1x2x14xf32> to vector<2x14xf32>
    %cst_98 = arith.constant dense<0.000000e+00> : vector<2x112xf32>
    %109 = tpu.matmul %108, %72, %cst_98 {dimension_numbers = #tpu.dot_dimension_numbers<[1], [0], [0], [1], [0, 0, 1, 1], [], []>} : vector<2x14xf32>, vector<14x112xf32>, vector<2x112xf32> -> vector<2x112xf32>
    %c5_99 = arith.constant 5 : index
    %c0_100 = arith.constant 0 : index
    %c0_101 = arith.constant 0 : index
    %110 = vector.load %arg11[%c5_99, %c0_100, %c0_101] : memref<7x112x128xf32, #tpu.memory_space<vmem>>, vector<1x112x128xf32>
    %111 = vector.shape_cast %110 : vector<1x112x128xf32> to vector<112x128xf32>
    %cst_102 = arith.constant dense<0.000000e+00> : vector<2x128xf32>
    %112 = tpu.matmul %109, %111, %cst_102 {dimension_numbers = #tpu.dot_dimension_numbers<[1], [0], [0], [1], [0, 0, 1, 1], [], []>} : vector<2x112xf32>, vector<112x128xf32>, vector<2x128xf32> -> vector<2x128xf32>
    %113 = arith.addf %106, %112 : vector<2x128xf32>
    %c6 = arith.constant 6 : index
    %c0_103 = arith.constant 0 : index
    %c0_104 = arith.constant 0 : index
    %114 = vector.load %arg10[%c6, %c0_103, %c0_104] : memref<7x2x14xf32, #tpu.memory_space<vmem>>, vector<1x2x14xf32>
    %115 = vector.shape_cast %114 : vector<1x2x14xf32> to vector<2x14xf32>
    %cst_105 = arith.constant dense<0.000000e+00> : vector<2x112xf32>
    %116 = tpu.matmul %115, %72, %cst_105 {dimension_numbers = #tpu.dot_dimension_numbers<[1], [0], [0], [1], [0, 0, 1, 1], [], []>} : vector<2x14xf32>, vector<14x112xf32>, vector<2x112xf32> -> vector<2x112xf32>
    %c6_106 = arith.constant 6 : index
    %c0_107 = arith.constant 0 : index
    %c0_108 = arith.constant 0 : index
    %117 = vector.load %arg11[%c6_106, %c0_107, %c0_108] : memref<7x112x128xf32, #tpu.memory_space<vmem>>, vector<1x112x128xf32>
    %118 = vector.shape_cast %117 : vector<1x112x128xf32> to vector<112x128xf32>
    %cst_109 = arith.constant dense<0.000000e+00> : vector<2x128xf32>
    %119 = tpu.matmul %116, %118, %cst_109 {dimension_numbers = #tpu.dot_dimension_numbers<[1], [0], [0], [1], [0, 0, 1, 1], [], []>} : vector<2x112xf32>, vector<112x128xf32>, vector<2x128xf32> -> vector<2x128xf32>
    %120 = arith.addf %113, %119 : vector<2x128xf32>
    %c0_110 = arith.constant 0 : index
    %c0_111 = arith.constant 0 : index
    %121 = vector.load %arg12[%c0_110, %c0_111] : memref<1x128xf32, #tpu.memory_space<vmem>>, vector<1x128xf32>
    %122 = vector.broadcast %121 : vector<1x128xf32> to vector<2x128xf32>
    %123 = arith.addf %120, %122 : vector<2x128xf32>
    %cst_112 = arith.constant 0.000000e+00 : f32
    %124 = vector.broadcast %cst_112 : f32 to vector<2x128xf32>
    %125 = arith.maximumf %123, %124 : vector<2x128xf32>
    %c0_113 = arith.constant 0 : index
    %c0_114 = arith.constant 0 : index
    %126 = vector.load %arg13[%c0_113, %c0_114] : memref<128x128xf32, #tpu.memory_space<vmem>>, vector<128x128xf32>
    %cst_115 = arith.constant dense<0.000000e+00> : vector<2x128xf32>
    %127 = tpu.matmul %125, %126, %cst_115 {dimension_numbers = #tpu.dot_dimension_numbers<[1], [0], [0], [1], [0, 0, 1, 1], [], []>} : vector<2x128xf32>, vector<128x128xf32>, vector<2x128xf32> -> vector<2x128xf32>
    %c0_116 = arith.constant 0 : index
    %c0_117 = arith.constant 0 : index
    %128 = vector.load %arg14[%c0_116, %c0_117] : memref<1x128xf32, #tpu.memory_space<vmem>>, vector<1x128xf32>
    %129 = vector.broadcast %128 : vector<1x128xf32> to vector<2x128xf32>
    %130 = arith.addf %127, %129 : vector<2x128xf32>
    %cst_118 = arith.constant 0.000000e+00 : f32
    %131 = vector.broadcast %cst_118 : f32 to vector<2x128xf32>
    %132 = arith.maximumf %130, %131 : vector<2x128xf32>
    %c0_119 = arith.constant 0 : index
    %c0_120 = arith.constant 0 : index
    %133 = vector.load %arg15[%c0_119, %c0_120] : memref<2x128xf32, #tpu.memory_space<vmem>>, vector<2x128xf32>
    tpu.vector_store %arg15[%c0_119, %c0_120], %132 {strides = array<i32>} : memref<2x128xf32, #tpu.memory_space<vmem>>, vector<2x128xf32>,
    return
  }
  func.func @transform_0(%arg0: i32) -> (i32, i32) {
    %c0_i32 = arith.constant 0 : i32
    %c0_i32_0 = arith.constant 0 : i32
    return %arg0, %c0_i32 : i32, i32
  }
  func.func @transform_1(%arg0: i32) -> (i32, i32, i32) {
    %c0_i32 = arith.constant 0 : i32
    %c0_i32_0 = arith.constant 0 : i32
    %c0_i32_1 = arith.constant 0 : i32
    %c0_i32_2 = arith.constant 0 : i32
    return %c0_i32, %c0_i32_0, %c0_i32_1 : i32, i32, i32
  }
  func.func @transform_2(%arg0: i32) -> (i32, i32, i32) {
    %c0_i32 = arith.constant 0 : i32
    %c0_i32_0 = arith.constant 0 : i32
    %c0_i32_1 = arith.constant 0 : i32
    %c0_i32_2 = arith.constant 0 : i32
    return %c0_i32, %c0_i32_0, %c0_i32_1 : i32, i32, i32
  }
  func.func @transform_3(%arg0: i32) -> (i32, i32) {
    %c0_i32 = arith.constant 0 : i32
    %c0_i32_0 = arith.constant 0 : i32
    %c0_i32_1 = arith.constant 0 : i32
    return %c0_i32, %c0_i32_0 : i32, i32
  }
  func.func @transform_4(%arg0: i32) -> (i32, i32, i32) {
    %c0_i32 = arith.constant 0 : i32
    %c0_i32_0 = arith.constant 0 : i32
    %c0_i32_1 = arith.constant 0 : i32
    %c0_i32_2 = arith.constant 0 : i32
    return %c0_i32, %c0_i32_0, %c0_i32_1 : i32, i32, i32
  }
  func.func @transform_5(%arg0: i32) -> (i32, i32, i32) {
    %c0_i32 = arith.constant 0 : i32
    %c0_i32_0 = arith.constant 0 : i32
    %c0_i32_1 = arith.constant 0 : i32
    %c0_i32_2 = arith.constant 0 : i32
    return %c0_i32, %c0_i32_0, %c0_i32_1 : i32, i32, i32
  }
  func.func @transform_6(%arg0: i32) -> (i32, i32) {
    %c0_i32 = arith.constant 0 : i32
    %c0_i32_0 = arith.constant 0 : i32
    %c0_i32_1 = arith.constant 0 : i32
    return %c0_i32, %c0_i32_0 : i32, i32
  }
  func.func @transform_7(%arg0: i32) -> (i32, i32) {
    %c0_i32 = arith.constant 0 : i32
    %c0_i32_0 = arith.constant 0 : i32
    %c0_i32_1 = arith.constant 0 : i32
    return %c0_i32, %c0_i32_0 : i32, i32
  }
  func.func @transform_8(%arg0: i32) -> (i32, i32) {
    %c0_i32 = arith.constant 0 : i32
    %c0_i32_0 = arith.constant 0 : i32
    %c0_i32_1 = arith.constant 0 : i32
    return %c0_i32, %c0_i32_0 : i32, i32
  }
  func.func @transform_9(%arg0: i32) -> (i32, i32, i32) {
    %c0_i32 = arith.constant 0 : i32
    %c0_i32_0 = arith.constant 0 : i32
    %c0_i32_1 = arith.constant 0 : i32
    %c0_i32_2 = arith.constant 0 : i32
    return %c0_i32, %c0_i32_0, %c0_i32_1 : i32, i32, i32
  }
  func.func @transform_10(%arg0: i32) -> (i32, i32, i32) {
    %c0_i32 = arith.constant 0 : i32
    %c0_i32_0 = arith.constant 0 : i32
    %c0_i32_1 = arith.constant 0 : i32
    %c0_i32_2 = arith.constant 0 : i32
    return %c0_i32, %c0_i32_0, %c0_i32_1 : i32, i32, i32
  }
  func.func @transform_11(%arg0: i32) -> (i32, i32) {
    %c0_i32 = arith.constant 0 : i32
    %c0_i32_0 = arith.constant 0 : i32
    %c0_i32_1 = arith.constant 0 : i32
    return %c0_i32, %c0_i32_0 : i32, i32
  }
  func.func @transform_12(%arg0: i32) -> (i32, i32) {
    %c0_i32 = arith.constant 0 : i32
    %c0_i32_0 = arith.constant 0 : i32
    %c0_i32_1 = arith.constant 0 : i32
    return %c0_i32, %c0_i32_0 : i32, i32
  }
  func.func @transform_13(%arg0: i32) -> (i32, i32) {
    %c0_i32 = arith.constant 0 : i32
    %c0_i32_0 = arith.constant 0 : i32
    %c0_i32_1 = arith.constant 0 : i32
    return %c0_i32, %c0_i32_0 : i32, i32
  }
  func.func @transform_14(%arg0: i32) -> (i32, i32) {
    %c0_i32 = arith.constant 0 : i32
    %c0_i32_0 = arith.constant 0 : i32
    return %arg0, %c0_i32 : i32, i32
  }
}

</mosaic_0001>

<bundles_post_ra>
// kernel: clfnet_forward.1
= control target key start
LH: loop header
LB: loop body
LE: loop exit
PB: predicated region body
PF: predicated region fallthrough
CT: control target
= control target key end

     0   :  { %vm106_vm0 = vcmask 1043456   ;;  %vm4859_vm1 = vmmov 1   ;;  %vm73_vm3 = vcmask 1046528   ;;  %vm89_vm4 = vcmask 228352   ;;  %s6057_s0 = inlined_call_operand.vmem [shape: f32[60,28], index: 0, kind: input, shape index: {}]   ;;  %s6058_s1 = inlined_call_operand.vmem [shape: f32[3,28,112], index: 1, kind: input, shape index: {}]   ;;  %s6059_s2 = inlined_call_operand.vmem [shape: f32[3,28,112], index: 2, kind: input, shape index: {}]   ;;  %s6060_s3 = inlined_call_operand.vmem [shape: f32[1,112], index: 3, kind: input, shape index: {}]   ;;  %s6061_s4 = inlined_call_operand.vmem [shape: f32[3,112,112], index: 4, kind: input, shape index: {}]   ;;  %s6062_s5 = inlined_call_operand.vmem [shape: f32[3,112,112], index: 5, kind: input, shape index: {}]   ;;  %s6063_s6 = inlined_call_operand.vmem [shape: f32[1,112], index: 6, kind: input, shape index: {}]   ;;  %s6064_s7 = inlined_call_operand.vmem [shape: f32[32,57], index: 7, kind: input, shape index: {}]   ;;  %s6065_s8 = inlined_call_operand.vmem [shape: f32[14,29], index: 8, kind: input, shape index: {}]   ;;  %s6066_s9 = inlined_call_operand.vmem [shape: f32[7,2,14], index: 9, kind: input, shape index: {}]   ;;  %s6067_s10 = inlined_call_operand.vmem [shape: f32[7,112,128], index: 10, kind: input, shape index: {}]   ;;  %s6068_s11 = inlined_call_operand.vmem [shape: f32[1,128], index: 11, kind: input, shape index: {}]   ;;  %s6069_s12 = inlined_call_operand.vmem [shape: f32[128,128], index: 12, kind: input, shape index: {}]   ;;  %s6070_s13 = inlined_call_operand.vmem [shape: f32[1,128], index: 13, kind: input, shape index: {}]   ;;  %s6071_s14 = inlined_call_operand.hbm [shape: f32[2,128], index: 14, kind: output, shape index: {}]  }
   0x1   :  { %v3055_v0 = vld [vmem:[%s6058_s1 + $0x20] sm:$0xff]  ;;  %v3056_v1 = vld [vmem:[%s6058_s1 + $0x28] sm:$0xff]  ;;  %v3057_v5 = vld [vmem:[%s6058_s1 + $0x30] sm:$0xff] }
   0x2   :  { %v3090_v2 = vld [vmem:[%s6059_s2 + $0x20] sm:$0xff]  ;;  %v4327_v3 = vpack.c.bf16 %v3056_v1, %v3055_v0  ;;  %v3091_v4 = vld [vmem:[%s6059_s2 + $0x28] sm:$0xff]  ;;  %v3058_v6 = vld [vmem:[%s6058_s1 + $0x38] sm:$0xf] }
   0x3   :  { %v4357_v7 = vpack.c.bf16 %v3091_v4, %v3090_v2  ;;  %v4331_v8 = vpack.c.bf16 %v3058_v6, %v3057_v5  ;;  %vm4958_vm2 = vmpackc.low %vm106_vm0, %vm4859_vm1  ;;  %v3092_v10 = vld [vmem:[%s6059_s2 + $0x30] sm:$0xff]  ;;  %v3093_v11 = vld [vmem:[%s6059_s2 + $0x38] sm:$0xf] }
   0x4   :  { %4328 = vmatprep.subr.bf16.mxu0 %v4327_v3  ;;  %v4361_v12 = vpack.c.bf16 %v3093_v11, %v3092_v10  ;;  %v4971_v13 = vld [vmem:[%s6057_s0] sm:$0xff]  ;;  %v4976_v14 = vld [vmem:[%s6057_s0 + $0x8] sm:$0xff]  ;;  %v4981_v15 = vld [vmem:[%s6057_s0 + $0x10] sm:$0xff] }
   0x5   :  { %4358 = vmatprep.subr.bf16.mxu1 %v4357_v7  ;;  %4330 = vmatpush3.bf16.msra.mxu0 %v4327_v3  ;;  %v74_v16 = vrot.slane %v4971_v13, 1  ;;  %v75_v17 = vrot.slane %v4976_v14, 1  ;;  %v77_v18 = vrot.slane %v4981_v15, 1  ;;  %v56_v19 = vld [vmem:[%s6058_s1] sm:$0xff]  ;;  %v57_v20 = vld [vmem:[%s6058_s1 + $0x8] sm:$0xff]  ;;  %v5003_v24 = vld [vmem:[%s6057_s0 + $0x18] sm:$0xff] }
   0x6   :  { %v492_v21 = vld [vmem:[%s6059_s2] sm:$0xff]  ;;  %4360 = vmatpush3.bf16.msra.mxu1 %v4357_v7  ;;  %4333 = vmatprep.subr.msk.bf16.mxu0 %vm4958_vm2, %v4331_v8  ;;  %v4337_v22 = vpack.c.bf16 %v57_v20, %v56_v19  ;;  %v493_v23 = vld [vmem:[%s6059_s2 + $0x8] sm:$0xff]  ;;  %v79_v28 = vrot.slane %v5003_v24, 1  ;;  %v58_v30 = vld [vmem:[%s6058_s1 + $0x10] sm:$0xff] }
   0x7   :  { %v5008_v25 = vld [vmem:[%s6057_s0 + $0x20] sm:$0xff]  ;;  %4363 = vmatprep.subr.msk.bf16.mxu1 %vm4958_vm2, %v4361_v12  ;;  %v76_v26 = vsel %vm73_vm3, %v74_v16, %v75_v17  ;;  %v4367_v27 = vpack.c.bf16 %v493_v23, %v492_v21  ;;  %v5017_v29 = vld [vmem:[%s6057_s0 + $0x28] sm:$0xff]  ;;  %v59_v31 = vld [vmem:[%s6058_s1 + $0x18] sm:$0xf]  ;;  %v78_v32 = vsel %vm73_vm3, %v75_v17, %v77_v18 }
   0x8   :  { %3677 = vmatprep.mubr.msk.f32.mxu0 %vm89_vm4, %v76_v26  ;;  %3737 = vmatprep.mubr.msk.f32.mxu1 %vm89_vm4, %v76_v26  ;;  %v81_v33 = vrot.slane %v5008_v25, 1  ;;  %v494_v34 = vld [vmem:[%s6059_s2 + $0x10] sm:$0xff]  ;;  %v495_v35 = vld [vmem:[%s6059_s2 + $0x18] sm:$0xf]  ;;  %v83_v36 = vrot.slane %v5017_v29, 1  ;;  %v80_v38 = vsel %vm73_vm3, %v77_v18, %v79_v28  ;;  %v4341_v39 = vpack.c.bf16 %v59_v31, %v58_v30  ;;  %v3077_v42 = vld [vmem:[%s6058_s1 + $0x40] sm:$0xff] }
   0x9   :  { %4336 = vmatpush3.bf16.msk.msra.mxu0 %vm4958_vm2, %v4331_v8  ;;  %v5043_v37 = vld [vmem:[%s6057_s0 + $0x30] sm:$0xff]  ;;  %v5049_v40 = vld [vmem:[%s6057_s0 + $0x38] sm:$0xf]  ;;  %v4371_v41 = vpack.c.bf16 %v495_v35, %v494_v34  ;;  %v3078_v43 = vld [vmem:[%s6058_s1 + $0x48] sm:$0xff] }
   0xa   :  { %4366 = vmatpush3.bf16.msk.msra.mxu1 %vm4958_vm2, %v4361_v12  ;;  %4338 = vmatprep.subr.bf16.mxu0 %v4337_v22 }
   0xb   :  { %4368 = vmatprep.subr.bf16.mxu1 %v4367_v27 }
   0xc   :  { %3678 = vmatmul.mubr.msk.f32.vlgmr.msra.gmra.mrb[0].mxu0 %vm89_vm4, %v78_v32 }
   0xd   :  { %19 = vsyncpa [#allocation3], 0  ;;  %3738 = vmatmul.mubr.msk.f32.vlgmr.msra.gmra.mrb[0].mxu1 %vm89_vm4, %v78_v32  ;;  %4340 = vmatpush3.bf16.msra.mxu0 %v4337_v22  ;;  %v82_v44 = vsel %vm73_vm3, %v79_v28, %v81_v33  ;;  %v85_v45 = vrot.slane %v5043_v37, 1  ;;  %v3112_v46 = vld [vmem:[%s6059_s2 + $0x40] sm:$0xff]  ;;  %v3113_v47 = vld [vmem:[%s6059_s2 + $0x48] sm:$0xff]  ;;  %v84_v48 = vsel %vm73_vm3, %v81_v33, %v83_v36  ;;  %v87_v49 = vrot.slane %v5049_v40, 1 }
   0xe   :  { %4370 = vmatpush3.bf16.msra.mxu1 %v4367_v27  ;;  %3680 = vmatprep.mubr.msk.f32.mxu0 %vm89_vm4, %v80_v38  ;;  %v4347_v50 = vpack.c.bf16 %v3078_v43, %v3077_v42  ;;  %v4377_v51 = vpack.c.bf16 %v3113_v47, %v3112_v46  ;;  %v3079_v54 = vld [vmem:[%s6058_s1 + $0x50] sm:$0xff]  ;;  %v3080_v55 = vld [vmem:[%s6058_s1 + $0x58] sm:$0xf]  ;;  %v345_v60 = vrot.slane %v4971_v13, 2  ;;  %v346_v61 = vrot.slane %v4976_v14, 2  ;;  %v908_v11 = vld [vmem:[%s6064_s7] sm:$0xff] }
   0xf   :  { %3740 = vmatprep.mubr.msk.f32.mxu1 %vm89_vm4, %v80_v38  ;;  %4343 = vmatprep.subr.msk.bf16.mxu0 %vm4958_vm2, %v4341_v39  ;;  %v86_v52 = vsel %vm73_vm3, %v83_v36, %v85_v45  ;;  %v88_v53 = vsel %vm73_vm3, %v85_v45, %v87_v49  ;;  %v3114_v56 = vld [vmem:[%s6059_s2 + $0x50] sm:$0xff]  ;;  %v3115_v57 = vld [vmem:[%s6059_s2 + $0x58] sm:$0xf]  ;;  %v4351_v58 = vpack.c.bf16 %v3080_v55, %v3079_v54  ;;  %vm344_vm5 = vcmask 1045504   ;;  %v3134_v16 = vld [vmem:[%s6061_s4 + $0x88] sm:$0xff]  ;;  %s4863_s17 = smov [#allocation2]  }
  0x10   :  { %3681 = vmatmul.mubr.msk.f32.gmra.mrb[2].mxu0 %vm89_vm4, %v82_v44  ;;  %4373 = vmatprep.subr.msk.bf16.mxu1 %vm4958_vm2, %v4371_v41  ;;  %v4381_v59 = vpack.c.bf16 %v3115_v57, %v3114_v56  ;;  %v348_v62 = vrot.slane %v4981_v15, 2  ;;  %v347_v63 = vsel %vm344_vm5, %v345_v60, %v346_v61  ;;  %v350_v0 = vrot.slane %v5003_v24, 2  ;;  %v3131_v12 = vld [vmem:[%s6061_s4 + $0x70] sm:$0xff]  ;;  %v3136_v19 = vld [vmem:[%s6061_s4 + $0x98] sm:$0xff]  ;;  %v3137_v21 = vld [vmem:[%s6061_s4 + $0xa0] sm:$0xff]  ;;  %s3047_s18 = sshll.u32 %s4863_s17, 4  ;;  %s3048_s18 = int_to_ptr.vmem [resolvable:$true] %s3047_s18 }
  0x11   :  { %3741 = vmatmul.mubr.msk.f32.gmra.mrb[2].mxu1 %vm89_vm4, %v82_v44  ;;  %3683 = vmatprep.mubr.msk.f32.mxu0 %vm89_vm4, %v84_v48  ;;  %v352_v2 = vrot.slane %v5008_v25, 2  ;;  %v354_v4 = vrot.slane %v5017_v29, 2  ;;  %v356_v6 = vrot.slane %v5043_v37, 2  ;;  %v358_v8 = vrot.slane %v5049_v40, 2  ;;  %v3135_v18 = vld [vmem:[%s6061_s4 + $0x90] sm:$0xff]  ;;  %v3138_v22 = vld [vmem:[%s6061_s4 + $0xa8] sm:$0xff]  ;;  %vm5583_vm14 = vmpackc.low %vm344_vm5, %vm4859_vm1  ;;  %p4840_p1 = scmp.lt.s32.totalorder %s3048_s18, %s3048_s18 }
  0x12   :  { %3743 = vmatprep.mubr.msk.f32.mxu1 %vm89_vm4, %v84_v48  ;;  %4346 = vmatpush3.bf16.msk.msra.mxu0 %vm4958_vm2, %v4341_v39  ;;  %v349_v1 = vsel %vm344_vm5, %v346_v61, %v348_v62  ;;  %v351_v3 = vsel %vm344_vm5, %v348_v62, %v350_v0  ;;  %vm912_vm6 = vcmask 465920   ;;  %v4413_v20 = vpack.c.bf16 %v3136_v19, %v3135_v18 }
  0x13   :  { %4376 = vmatpush3.bf16.msk.msra.mxu1 %vm4958_vm2, %v4371_v41  ;;  %4348 = vmatprep.subr.bf16.mxu0 %v4347_v50  ;;  %v353_v5 = vsel %vm344_vm5, %v350_v0, %v352_v2  ;;  %v355_v7 = vsel %vm344_vm5, %v352_v2, %v354_v4  ;;  %v357_v9 = vsel %vm344_vm5, %v354_v4, %v356_v6  ;;  %vm925_vm7 = vcmask 1040384  }
  0x14   :  { %3684 = vmatmul.mubr.msk.f32.gmra.mrb[4].mxu0 %vm89_vm4, %v86_v52  ;;  %4378 = vmatprep.subr.bf16.mxu1 %v4377_v51  ;;  %v359_v10 = vsel %vm344_vm5, %v356_v6, %v358_v8  ;;  %v4417_v23 = vpack.c.bf16 %v3138_v22, %v3137_v21  ;;  %vm4400_vm8 = vmpackc.low %vm925_vm7, %vm4859_vm1  ;;  %vm1054_vm9 = vcmask 916480   ;;  %vm1703_vm10 = vcmask 236544  }
  0x15   :  { %3744 = vmatmul.mubr.msk.f32.gmra.mrb[4].mxu1 %vm89_vm4, %v86_v52  ;;  %3686 = vmatprep.mubr.msk.f32.mxu0 %vm89_vm4, %v88_v53  ;;  %vm1710_vm11 = vcmask 1044480   ;;  %vm4861_vm13 = vmmov 0   ;;  %vm1790_vm15 = vcmask 113664  }
  0x16   :  { %3746 = vmatprep.mubr.msk.f32.mxu1 %vm89_vm4, %v88_v53  ;;  %vm4578_vm12 = vmpackc.low %vm1710_vm11, %vm4859_vm1 }
  0x18   :  { %3687 = vmatmul.mubr.msk.f32.gmra.mrb[6].mxu0 %vm89_vm4, %v87_v49 }
  0x19   :  { %3747 = vmatmul.mubr.msk.f32.gmra.mrb[6].mxu1 %vm89_vm4, %v87_v49  ;;  %3697 = vmatprep.mubr.msk.f32.mxu0 %vm89_vm4, %v4971_v13 }
  0x1a   :  { %3757 = vmatprep.mubr.msk.f32.mxu1 %vm89_vm4, %v4971_v13  ;;  %v3132_v13 = vld [vmem:[%s6061_s4 + $0x78] sm:$0xff] }
  0x1c   :  { %3698 = vmatmul.mubr.msk.f32.vlgmr.msra.gmra.mrb[0].mxu0 %vm89_vm4, %v4976_v14 }
  0x1d   :  { %3758 = vmatmul.mubr.msk.f32.vlgmr.msra.gmra.mrb[0].mxu1 %vm89_vm4, %v4976_v14  ;;  %4350 = vmatpush3.bf16.msra.mxu0 %v4347_v50  ;;  %v4405_v14 = vpack.c.bf16 %v3132_v13, %v3131_v12 }
  0x1e   :  { %4380 = vmatpush3.bf16.msra.mxu1 %v4377_v51  ;;  %3700 = vmatprep.mubr.msk.f32.mxu0 %vm89_vm4, %v4981_v15 }
  0x1f   :  { %3760 = vmatprep.mubr.msk.f32.mxu1 %vm89_vm4, %v4981_v15  ;;  %4353 = vmatprep.subr.msk.bf16.mxu0 %vm4958_vm2, %v4351_v58  ;;  %v3133_v15 = vld [vmem:[%s6061_s4 + $0x80] sm:$0xff] }
  0x20   :  { %3701 = vmatmul.mubr.msk.f32.gmra.mrb[2].mxu0 %vm89_vm4, %v5003_v24  ;;  %4383 = vmatprep.subr.msk.bf16.mxu1 %vm4958_vm2, %v4381_v59  ;;  %v4409_v17 = vpack.c.bf16 %v3134_v16, %v3133_v15 }
  0x21   :  { %3761 = vmatmul.mubr.msk.f32.gmra.mrb[2].mxu1 %vm89_vm4, %v5003_v24  ;;  %3703 = vmatprep.mubr.msk.f32.mxu0 %vm89_vm4, %v5008_v25  ;;  %v3139_v24 = vld [vmem:[%s6061_s4 + $0xb0] sm:$0xff] }
  0x22   :  { %3763 = vmatprep.mubr.msk.f32.mxu1 %vm89_vm4, %v5008_v25  ;;  %4356 = vmatpush3.bf16.msk.msra.mxu0 %vm4958_vm2, %v4351_v58  ;;  %v3140_v25 = vld [vmem:[%s6061_s4 + $0xb8] sm:$0xff] }
  0x23   :  { %4386 = vmatpush3.bf16.msk.msra.mxu1 %vm4958_vm2, %v4381_v59  ;;  %v4421_v26 = vpack.c.bf16 %v3140_v25, %v3139_v24 }
  0x24   :  { %3704 = vmatmul.mubr.msk.f32.gmra.mrb[4].mxu0 %vm89_vm4, %v5017_v29  ;;  %4406 = vmatprep.subr.bf16.mxu1 %v4405_v14 }
  0x25   :  { %3764 = vmatmul.mubr.msk.f32.gmra.mrb[4].mxu1 %vm89_vm4, %v5017_v29  ;;  %3706 = vmatprep.mubr.msk.f32.mxu0 %vm89_vm4, %v5043_v37  ;;  %v3125_v29 = vld [vmem:[%s6060_s3] ss:$0 sm:$0xff] }
  0x26   :  { %3766 = vmatprep.mubr.msk.f32.mxu1 %vm89_vm4, %v5043_v37 }
  0x28   :  { %3707 = vmatmul.mubr.msk.f32.gmra.mrb[6].mxu0 %vm89_vm4, %v5049_v40 }
  0x29   :  { %3767 = vmatmul.mubr.msk.f32.gmra.mrb[6].mxu1 %vm89_vm4, %v5049_v40  ;;  %3717 = vmatprep.mubr.msk.f32.mxu0 %vm89_vm4, %v347_v63 }
  0x2a   :  { %3777 = vmatprep.mubr.msk.f32.mxu1 %vm89_vm4, %v347_v63 }
  0x2c   :  { %3718 = vmatmul.mubr.msk.f32.vlgmr.msra.gmra.mrb[0].mxu0 %vm89_vm4, %v349_v1 }
  0x2d   :  { %3778 = vmatmul.mubr.msk.f32.vlgmr.msra.gmra.mrb[0].mxu1 %vm89_vm4, %v349_v1  ;;  %3720 = vmatprep.mubr.msk.f32.mxu0 %vm89_vm4, %v351_v3 }
  0x2e   :  { %3780 = vmatprep.mubr.msk.f32.mxu1 %vm89_vm4, %v351_v3  ;;  %4408 = vmatpush3.bf16.msra.mxu1 %v4405_v14 }
  0x2f   :  { %4410 = vmatprep.subr.bf16.mxu1 %v4409_v17 }
  0x30   :  { %3721 = vmatmul.mubr.msk.f32.gmra.mrb[2].mxu0 %vm89_vm4, %v353_v5 }
  0x31   :  { %3781 = vmatmul.mubr.msk.f32.gmra.mrb[2].mxu1 %vm89_vm4, %v353_v5  ;;  %3723 = vmatprep.mubr.msk.f32.mxu0 %vm89_vm4, %v355_v7 }
  0x32   :  { %3783 = vmatprep.mubr.msk.f32.mxu1 %vm89_vm4, %v355_v7  ;;  %4412 = vmatpush3.bf16.msra.mxu1 %v4409_v17 }
  0x33   :  { %4414 = vmatprep.subr.bf16.mxu1 %v4413_v20 }
  0x34   :  { %3724 = vmatmul.mubr.msk.f32.gmra.mrb[4].mxu0 %vm89_vm4, %v357_v9 }
  0x35   :  { %3784 = vmatmul.mubr.msk.f32.gmra.mrb[4].mxu1 %vm89_vm4, %v357_v9  ;;  %3726 = vmatprep.mubr.msk.f32.mxu0 %vm89_vm4, %v359_v10 }
  0x36   :  { %3786 = vmatprep.mubr.msk.f32.mxu1 %vm89_vm4, %v359_v10  ;;  %4416 = vmatpush3.bf16.msra.mxu1 %v4413_v20 }
  0x37   :  { %4418 = vmatprep.subr.bf16.mxu1 %v4417_v23 }
  0x38   :  { %3727 = vmatmul.mubr.msk.f32.gmra.mrb[6].mxu0 %vm89_vm4, %v358_v8 }
  0x39   :  { %3787 = vmatmul.mubr.msk.f32.gmra.mrb[6].mxu1 %vm89_vm4, %v358_v8  ;;  %3805 = vmatprep.mubr.msk.f32.mxu0 %vm912_vm6, %v908_v11 }
  0x3a   :  { %4420 = vmatpush3.bf16.msra.mxu1 %v4417_v23 }
  0x3b   :  { %4422 = vmatprep.subr.bf16.mxu1 %v4421_v26 }
  0x3e   :  { %4424 = vmatpush3.bf16.msra.mxu1 %v4421_v26 }
  0xff   :  { %v3719_v27 = vpop.f32.mrb[0].mxu0 }
 0x100   :  { %v3779_v28 = vpop.f32.mrb[0].mxu1  ;;  %v445_v30 = vpop.f32.mrb[1].mxu0 }
 0x101   :  { %v839_v31 = vmax.f32 %v3719_v27, %v3779_v28  ;;  %v791_v32 = vpop.f32.mrb[1].mxu1 }
 0x102   :  { %v838_v33 = vmax.f32 %v445_v30, %v791_v32  ;;  %v3172_v32 = vld [vmem:[%s6062_s5 + $0x78] sm:$0xff] }
 0x103   :  { %v854_v34 = vadd.f32 %v3125_v29, %v839_v31  ;;  %v3722_v35 = vpop.f32.mrb[2].mxu0  ;;  %v3171_v31 = vld [vmem:[%s6062_s5 + $0x70] sm:$0xff] }
 0x104   :  { %v853_v36 = vadd.f32 %v3125_v29, %v838_v33  ;;  %v3782_v37 = vpop.f32.mrb[2].mxu1  ;;  %v455_v38 = vpop.f32.mrb[3].mxu0  ;;  %v4489_v33 = vpack.c.bf16 %v3172_v32, %v3171_v31  ;;  %v1020_v31 = vld [vmem:[%s6061_s4 + $0x30] sm:$0xff] }
 0x105   :  { %v862_v39 = vmax.f32 %v854_v34, 0.0  ;;  %v841_v40 = vmax.f32 %v3722_v35, %v3782_v37  ;;  %v801_v41 = vpop.f32.mrb[3].mxu1  ;;  %v3173_v34 = vld [vmem:[%s6062_s5 + $0x80] sm:$0xff]  ;;  %v3174_v35 = vld [vmem:[%s6062_s5 + $0x88] sm:$0xff]  ;;  %v910_v37 = vld [vmem:[%s6064_s7 + $0x10] sm:$0xff] }
 0x106   :  { %v861_v42 = vmax.f32 %v853_v36, 0.0  ;;  %v840_v43 = vmax.f32 %v455_v38, %v801_v41  ;;  %v909_v36 = vld [vmem:[%s6064_s7 + $0x8] sm:$0xff]  ;;  %v4493_v38 = vpack.c.bf16 %v3174_v35, %v3173_v34  ;;  %v911_v41 = vld [vmem:[%s6064_s7 + $0x18] sm:$0xff]  ;;  %v1366_v35 = vld [vmem:[%s6062_s5 + $0x30] sm:$0xff] }
 0x107   :  { %v878_v44 = vrot.slane %v862_v39, 1  ;;  %v856_v45 = vadd.f32 %v3125_v29, %v841_v40  ;;  %v3725_v46 = vpop.f32.mrb[4].mxu0  ;;  %v3176_v40 = vld [vmem:[%s6062_s5 + $0x98] sm:$0xff] }
 0x108   :  { %v877_v47 = vrot.slane %v861_v42, 1  ;;  %v855_v48 = vadd.f32 %v3125_v29, %v840_v43  ;;  %v3785_v49 = vpop.f32.mrb[4].mxu1  ;;  %v465_v50 = vpop.f32.mrb[5].mxu0  ;;  %v3177_v43 = vld [vmem:[%s6062_s5 + $0xa0] sm:$0xff]  ;;  %v1021_v34 = vld [vmem:[%s6061_s4 + $0x38] sm:$0xff] }
 0x109   :  { %v864_v51 = vmax.f32 %v856_v45, 0.0  ;;  %v843_v52 = vmax.f32 %v3725_v46, %v3785_v49  ;;  %v811_v53 = vpop.f32.mrb[5].mxu1  ;;  %v3179_v46 = vld [vmem:[%s6062_s5 + $0xb0] sm:$0xff]  ;;  %v3141_v49 = vld [vmem:[%s6061_s4 + $0xc0] sm:$0xff] }
 0x10a   :  { %v879_v54 = vsel %vm73_vm3, %v877_v47, %v878_v44  ;;  %v863_v55 = vmax.f32 %v855_v48, 0.0  ;;  %v842_v56 = vmax.f32 %v465_v50, %v811_v53  ;;  %v3180_v47 = vld [vmem:[%s6062_s5 + $0xb8] sm:$0xff]  ;;  %v3142_v50 = vld [vmem:[%s6061_s4 + $0xc8] sm:$0xff] }
 0x10b   :  { %v900_v57 = vmax.f32 %v861_v42, %v879_v54  ;;  %v882_v58 = vrot.slane %v864_v51, 1  ;;  %v858_v59 = vadd.f32 %v3125_v29, %v843_v52  ;;  %v3728_v60 = vpop.f32.mrb[6].mxu0  ;;  %v4505_v48 = vpack.c.bf16 %v3180_v47, %v3179_v46  ;;  %v3182_v53 = vld [vmem:[%s6062_s5 + $0xc8] sm:$0xff]  ;;  %v1025_v46 = vld [vmem:[%s6061_s4 + $0x58] sm:$0xff]  ;;  %v1370_v47 = vld [vmem:[%s6062_s5 + $0x50] sm:$0xff] }
 0x10c   :  { %v880_v61 = vrot.slane %v863_v55, 1  ;;  %v857_v62 = vadd.f32 %v3125_v29, %v842_v56  ;;  %v3788_v63 = vpop.f32.mrb[6].mxu1  ;;  %v475_v0 = vpop.f32.mrb[7].mxu0  ;;  %v4425_v52 = vpack.c.bf16 %v3142_v50, %v3141_v49  ;;  %v3144_v56 = vld [vmem:[%s6061_s4 + $0xd8] sm:$0xff] }
 0x10d   :  { %v866_v1 = vmax.f32 %v858_v59, 0.0  ;;  %v845_v2 = vmax.f32 %v3728_v60, %v3788_v63  ;;  %v821_v3 = vpop.f32.mrb[7].mxu1  ;;  %v3184_v59 = vld [vmem:[%s6062_s5 + $0xd8] sm:$0xff]  ;;  %v1360_v63 = vld [vmem:[%s6062_s5] sm:$0xff] }
 0x10e   :  { %v883_v4 = vsel %vm73_vm3, %v880_v61, %v882_v58  ;;  %v865_v5 = vmax.f32 %v857_v62, 0.0  ;;  %v844_v6 = vmax.f32 %v475_v0, %v821_v3  ;;  %v881_v7 = vsel %vm73_vm3, %v878_v44, %v880_v61  ;;  %v3178_v44 = vld [vmem:[%s6062_s5 + $0xa8] sm:$0xff]  ;;  %4426 = vmatprep.subr.bf16.mxu1 %v4425_v52  ;;  %v1014_v61 = vld [vmem:[%s6061_s4] sm:$0xff] }
 0x10f   :  { %v902_v8 = vmax.f32 %v863_v55, %v883_v4  ;;  %v886_v9 = vrot.slane %v866_v1, 1  ;;  %v860_v10 = vadd.f32 %v3125_v29, %v845_v2  ;;  %v901_v11 = vmax.f32 %v862_v39, %v881_v7  ;;  %v3175_v39 = vld [vmem:[%s6062_s5 + $0x90] sm:$0xff]  ;;  %4428 = vmatpush3.bf16.msra.mxu1 %v4425_v52  ;;  %v1015_v62 = vld [vmem:[%s6061_s4 + $0x8] sm:$0xff] }
 0x110   :  { %v884_v12 = vrot.slane %v865_v5, 1  ;;  %v859_v13 = vadd.f32 %v3125_v29, %v844_v6  ;;  %v4497_v42 = vpack.c.bf16 %v3176_v40, %v3175_v39  ;;  %v4501_v45 = vpack.c.bf16 %v3178_v44, %v3177_v43  ;;  %v3143_v55 = vld [vmem:[%s6061_s4 + $0xd0] sm:$0xff]  ;;  %v1022_v39 = vld [vmem:[%s6061_s4 + $0x40] sm:$0xff]  ;;  %v1023_v40 = vld [vmem:[%s6061_s4 + $0x48] sm:$0xff] }
 0x111   :  { %v868_v14 = vmax.f32 %v860_v10, 0.0  ;;  %v4387_v15 = vpack.c.bf16 %v901_v11, %v900_v57  ;;  %v3183_v57 = vld [vmem:[%s6062_s5 + $0xd0] sm:$0xff]  ;;  %v4433_v0 = vpack.c.bf16 %v1015_v62, %v1014_v61  ;;  %v4449_v43 = vpack.c.bf16 %v1023_v40, %v1022_v39  ;;  %v1027_v52 = vld [vmem:[%s6061_s4 + $0x68] sm:$0xff]  ;;  %v3211_v40 = vld [vmem:[%s6063_s6] ss:$0 sm:$0xff] }
 0x112   :  { %v887_v16 = vsel %vm73_vm3, %v884_v12, %v886_v9  ;;  %v867_v17 = vmax.f32 %v859_v13, 0.0  ;;  %v885_v18 = vsel %vm73_vm3, %v882_v58, %v884_v12  ;;  %v4429_v58 = vpack.c.bf16 %v3144_v56, %v3143_v55  ;;  %v1017_v12 = vld [vmem:[%s6061_s4 + $0x18] sm:$0xff]  ;;  %v1362_v13 = vld [vmem:[%s6062_s5 + $0x10] sm:$0xff] }
 0x113   :  { %v904_v19 = vmax.f32 %v865_v5, %v887_v16  ;;  %v890_v20 = vrot.slane %v868_v14, 1  ;;  %4388 = vmatprep.subr.bf16.mxu0 %v4387_v15  ;;  %v903_v21 = vmax.f32 %v864_v51, %v885_v18  ;;  %v3181_v51 = vld [vmem:[%s6062_s5 + $0xc0] sm:$0xff]  ;;  %v4513_v60 = vpack.c.bf16 %v3184_v59, %v3183_v57 }
 0x114   :  { %v888_v22 = vrot.slane %v867_v17, 1  ;;  %4390 = vmatpush3.bf16.msra.mxu0 %v4387_v15  ;;  %v4509_v54 = vpack.c.bf16 %v3182_v53, %v3181_v51  ;;  %4430 = vmatprep.subr.bf16.mxu1 %v4429_v58  ;;  %v1026_v51 = vld [vmem:[%s6061_s4 + $0x60] sm:$0xff] }
 0x115   :  { %v4391_v23 = vpack.c.bf16 %v903_v21, %v902_v8  ;;  %v907_v26 = vmax.f32 %v868_v14, %v890_v20  ;;  %4432 = vmatpush3.bf16.msra.mxu1 %v4429_v58  ;;  %v1363_v14 = vld [vmem:[%s6062_s5 + $0x18] sm:$0xff]  ;;  %v1372_v53 = vld [vmem:[%s6062_s5 + $0x60] sm:$0xff]  ;;  %v4457_v55 = vpack.c.bf16 %v1027_v52, %v1026_v51  ;;  %v3154_v58 = vld [vmem:[%s6061_s4 + $0xe8] sm:$0xff] }
 0x116   :  { %v891_v24 = vsel %vm73_vm3, %v888_v22, %v890_v20  ;;  %v889_v25 = vsel %vm73_vm3, %v886_v9, %v888_v22  ;;  %4434 = vmatprep.subr.bf16.mxu1 %v4433_v0  ;;  %v1016_v9 = vld [vmem:[%s6061_s4 + $0x10] sm:$0xff]  ;;  %v4521_v22 = vpack.c.bf16 %v1363_v14, %v1362_v13  ;;  %v3153_v57 = vld [vmem:[%s6061_s4 + $0xe0] sm:$0xff]  ;;  %v3160_v13 = vld [vmem:[%s6061_s4 + $0x118] sm:$0xff] }
 0x117   :  { %v906_v27 = vmax.f32 %v867_v17, %v891_v24  ;;  %4392 = vmatprep.subr.bf16.mxu0 %v4391_v23  ;;  %v905_v28 = vmax.f32 %v866_v1, %v889_v25  ;;  %v1361_v1 = vld [vmem:[%s6062_s5 + $0x8] sm:$0xff]  ;;  %v4437_v21 = vpack.c.bf16 %v1017_v12, %v1016_v9  ;;  %v1018_v25 = vld [vmem:[%s6061_s4 + $0x20] sm:$0xff]  ;;  %v4461_v61 = vpack.c.bf16 %v3154_v58, %v3153_v57  ;;  %v3159_v12 = vld [vmem:[%s6061_s4 + $0x110] sm:$0xff] }
 0x118   :  { %4394 = vmatpush3.bf16.msra.mxu0 %v4391_v23  ;;  %v4517_v2 = vpack.c.bf16 %v1361_v1, %v1360_v63  ;;  %v3193_v59 = vld [vmem:[%s6062_s5 + $0xe0] sm:$0xff]  ;;  %v3155_v63 = vld [vmem:[%s6061_s4 + $0xf0] sm:$0xff]  ;;  %v3198_v9 = vld [vmem:[%s6062_s5 + $0x108] sm:$0xff] }
 0x119   :  { %v4399_v29 = vpack.c.bf16 %v907_v26, %v906_v27  ;;  %v4395_v30 = vpack.c.bf16 %v905_v28, %v904_v19  ;;  %v1019_v28 = vld [vmem:[%s6061_s4 + $0x28] sm:$0xff]  ;;  %v3195_v1 = vld [vmem:[%s6062_s5 + $0xf0] sm:$0xff] }
 0x11a   :  { %v4441_v32 = vpack.c.bf16 %v1019_v28, %v1018_v25  ;;  %v3199_v14 = vld [vmem:[%s6062_s5 + $0x110] sm:$0xff]  ;;  %v3164_v25 = vld [vmem:[%s6061_s4 + $0x138] sm:$0xff] }
 0x11b   :  { %4396 = vmatprep.subr.bf16.mxu0 %v4395_v30  ;;  %v3203_v28 = vld [vmem:[%s6062_s5 + $0x130] sm:$0xff] }
 0x11c   :  { %4398 = vmatpush3.bf16.msra.mxu0 %v4395_v30  ;;  %v1365_v30 = vld [vmem:[%s6062_s5 + $0x28] sm:$0xff] }
 0x11d   :  { %4401 = vmatprep.subr.msk.bf16.mxu0 %vm4400_vm8, %v4399_v29 }
 0x120   :  { %4404 = vmatpush3.bf16.msk.msra.mxu0 %vm4400_vm8, %v4399_v29  ;;  %v1364_v29 = vld [vmem:[%s6062_s5 + $0x20] sm:$0xff] }
 0x121   :  { %4490 = vmatprep.subr.bf16.mxu0 %v4489_v33 }
 0x123   :  { %3806 = vmatmul.mubr.msk.f32.vlgmr.msra.gmra.mrb[8].mxu0 %vm912_vm6, %v909_v36  ;;  %v1367_v36 = vld [vmem:[%s6062_s5 + $0x38] sm:$0xff] }
 0x124   :  { %3808 = vmatprep.mubr.msk.f32.mxu0 %vm912_vm6, %v910_v37  ;;  %4492 = vmatpush3.bf16.msra.mxu0 %v4489_v33  ;;  %v4525_v33 = vpack.c.bf16 %v1365_v30, %v1364_v29  ;;  %v4445_v37 = vpack.c.bf16 %v1021_v34, %v1020_v31  ;;  %v3204_v29 = vld [vmem:[%s6062_s5 + $0x138] sm:$0xff]  ;;  %v3205_v34 = vld [vmem:[%s6062_s5 + $0x140] sm:$0xff] }
 0x125   :  { %4494 = vmatprep.subr.bf16.mxu0 %v4493_v38  ;;  %v4565_v31 = vpack.c.bf16 %v3204_v29, %v3203_v28  ;;  %v3231_v28 = vld [vmem:[%s6067_s10 + $0xc8] sm:$0xff] }
 0x127   :  { %3809 = vmatmul.mubr.msk.f32.gmra.mrb[10].mxu0 %vm912_vm6, %v911_v41  ;;  %v1368_v41 = vld [vmem:[%s6062_s5 + $0x40] sm:$0xff] }
 0x128   :  { %4496 = vmatpush3.bf16.msra.mxu0 %v4493_v38  ;;  %v4529_v38 = vpack.c.bf16 %v1367_v36, %v1366_v35  ;;  %v3206_v35 = vld [vmem:[%s6062_s5 + $0x148] sm:$0xff] }
 0x129   :  { %4498 = vmatprep.subr.bf16.mxu0 %v4497_v42 }
 0x12c   :  { %4500 = vmatpush3.bf16.msra.mxu0 %v4497_v42  ;;  %v1369_v42 = vld [vmem:[%s6062_s5 + $0x48] sm:$0xff] }
 0x12d   :  { %4502 = vmatprep.subr.bf16.mxu0 %v4501_v45  ;;  %v4533_v44 = vpack.c.bf16 %v1369_v42, %v1368_v41 }
 0x130   :  { %4504 = vmatpush3.bf16.msra.mxu0 %v4501_v45  ;;  %v1024_v45 = vld [vmem:[%s6061_s4 + $0x50] sm:$0xff] }
 0x131   :  { %4506 = vmatprep.subr.bf16.mxu0 %v4505_v48  ;;  %v4453_v49 = vpack.c.bf16 %v1025_v46, %v1024_v45 }
 0x134   :  { %4508 = vmatpush3.bf16.msra.mxu0 %v4505_v48  ;;  %v1371_v48 = vld [vmem:[%s6062_s5 + $0x58] sm:$0xff] }
 0x135   :  { %4510 = vmatprep.subr.bf16.mxu0 %v4509_v54  ;;  %v4537_v50 = vpack.c.bf16 %v1371_v48, %v1370_v47 }
 0x138   :  { %4512 = vmatpush3.bf16.msra.mxu0 %v4509_v54  ;;  %v1373_v54 = vld [vmem:[%s6062_s5 + $0x68] sm:$0xff] }
 0x139   :  { %4514 = vmatprep.subr.bf16.mxu0 %v4513_v60  ;;  %v4541_v56 = vpack.c.bf16 %v1373_v54, %v1372_v53 }
 0x13c   :  { %4516 = vmatpush3.bf16.msra.mxu0 %v4513_v60  ;;  %v3194_v60 = vld [vmem:[%s6062_s5 + $0xe8] sm:$0xff] }
 0x13d   :  { %4518 = vmatprep.subr.bf16.mxu0 %v4517_v2  ;;  %v4545_v62 = vpack.c.bf16 %v3194_v60, %v3193_v59 }
 0x1f6   :  { %v5297_v3 = vpop.f32.mrb[8].mxu0 }
 0x1f7   :  { %v1048_v4 = vrot.slane %v5297_v3, 1  ;;  %v1257_v5 = vrot.slane %v5297_v3, 2  ;;  %v995_v6 = vpop.f32.mrb[9].mxu0 }
 0x1f8   :  { %v1047_v7 = vrot.slane %v995_v6, 1  ;;  %v1256_v8 = vrot.slane %v995_v6, 2 }
 0x1fa   :  { %v5304_v10 = vpop.f32.mrb[10].mxu0  ;;  %v1049_v11 = vsel %vm73_vm3, %v1047_v7, %v1048_v4  ;;  %v5317_v15 = vsel %vm344_vm5, %v1256_v8, %v1257_v5  ;;  %v3158_v7 = vld [vmem:[%s6061_s4 + $0x108] sm:$0xff]  ;;  %v3197_v8 = vld [vmem:[%s6062_s5 + $0x100] sm:$0xff] }
 0x1fb   :  { %v1052_v16 = vrot.slane %v5304_v10, 1  ;;  %v5321_v17 = vrot.slane %v5304_v10, 2  ;;  %v5323_v18 = vpop.f32.mrb[11].mxu0  ;;  %3839 = vmatprep.mubr.msk.f32.mxu1 %vm1054_vm9, %v1049_v11  ;;  %3941 = vmatprep.mubr.msk.f32.mxu0 %vm1054_vm9, %v1049_v11  ;;  %v4553_v11 = vpack.c.bf16 %v3198_v9, %v3197_v8  ;;  %v4860_v8 = vmov 0.0|0.0  }
 0x1fc   :  { %v1050_v19 = vrot.slane %v5323_v18, 1  ;;  %v1259_v20 = vrot.slane %v5323_v18, 2  ;;  %v4862_v9 = vmov 0.0  }
 0x1fe   :  { %v1051_v23 = vsel %vm73_vm3, %v1048_v4, %v1050_v19  ;;  %v1053_v24 = vsel %vm73_vm3, %v1050_v19, %v1052_v16  ;;  %v5335_v26 = vsel %vm344_vm5, %v1257_v5, %v1259_v20  ;;  %v5339_v27 = vsel %vm344_vm5, %v1259_v20, %v5321_v17  ;;  %v3161_v19 = vld [vmem:[%s6061_s4 + $0x120] sm:$0xff]  ;;  %v3162_v20 = vld [vmem:[%s6061_s4 + $0x128] sm:$0xff] }
 0x1ff   :  { %3840 = vmatmul.mubr.msk.f32.vlgmr.msra.gmra.mrb[8].mxu1 %vm1054_vm9, %v1051_v23  ;;  %3942 = vmatmul.mubr.msk.f32.vlgmr.msra.gmra.mrb[12].mxu0 %vm1054_vm9, %v1051_v23 }
 0x200   :  { %4436 = vmatpush3.bf16.msra.mxu1 %v4433_v0  ;;  %4520 = vmatpush3.bf16.msra.mxu0 %v4517_v2  ;;  %v3156_v0 = vld [vmem:[%s6061_s4 + $0xf8] sm:$0xff] }
 0x201   :  { %3842 = vmatprep.mubr.msk.f32.mxu1 %vm1054_vm9, %v1053_v24  ;;  %3944 = vmatprep.mubr.msk.f32.mxu0 %vm1054_vm9, %v1053_v24  ;;  %v3196_v2 = vld [vmem:[%s6062_s5 + $0xf8] sm:$0xff]  ;;  %v4465_v4 = vpack.c.bf16 %v3156_v0, %v3155_v63  ;;  %v3163_v24 = vld [vmem:[%s6061_s4 + $0x130] sm:$0xff] }
 0x202   :  { %4438 = vmatprep.subr.bf16.mxu1 %v4437_v21  ;;  %4522 = vmatprep.subr.bf16.mxu0 %v4521_v22  ;;  %v4549_v5 = vpack.c.bf16 %v3196_v2, %v3195_v1  ;;  %v4481_v30 = vpack.c.bf16 %v3164_v25, %v3163_v24  ;;  %v3230_v25 = vld [vmem:[%s6067_s10 + $0xc0] sm:$0xff] }
 0x203   :  { %3843 = vmatmul.mubr.msk.f32.gmra.mrb[10].mxu1 %vm1054_vm9, %v1052_v16  ;;  %3945 = vmatmul.mubr.msk.f32.gmra.mrb[14].mxu0 %vm1054_vm9, %v1052_v16  ;;  %v3200_v16 = vld [vmem:[%s6062_s5 + $0x118] sm:$0xff]  ;;  %v4607_v29 = vpack.c.bf16 %v3231_v28, %v3230_v25  ;;  %v3247_v25 = vld [vmem:[%s6067_s10 + $0x120] sm:$0xff]  ;;  %v3248_v28 = vld [vmem:[%s6067_s10 + $0x128] sm:$0xff] }
 0x204   :  { %4440 = vmatpush3.bf16.msra.mxu1 %v4437_v21  ;;  %4524 = vmatpush3.bf16.msra.mxu0 %v4521_v22  ;;  %v3201_v21 = vld [vmem:[%s6062_s5 + $0x120] sm:$0xff]  ;;  %v4477_v22 = vpack.c.bf16 %v3162_v20, %v3161_v19 }
 0x205   :  { %3873 = vmatprep.mubr.msk.f32.mxu1 %vm1054_vm9, %v995_v6  ;;  %3975 = vmatprep.mubr.msk.f32.mxu0 %vm1054_vm9, %v995_v6  ;;  %v3157_v6 = vld [vmem:[%s6061_s4 + $0x100] sm:$0xff] }
 0x206   :  { %4442 = vmatprep.subr.bf16.mxu1 %v4441_v32  ;;  %4526 = vmatprep.subr.bf16.mxu0 %v4525_v33  ;;  %v3226_v20 = vld [vmem:[%s6067_s10 + $0xa0] sm:$0xff] }
 0x208   :  { %4444 = vmatpush3.bf16.msra.mxu1 %v4441_v32  ;;  %4528 = vmatpush3.bf16.msra.mxu0 %v4525_v33  ;;  %v3165_v32 = vld [vmem:[%s6061_s4 + $0x140] sm:$0xff]  ;;  %v3166_v33 = vld [vmem:[%s6061_s4 + $0x148] sm:$0xff] }
 0x209   :  { %4446 = vmatprep.subr.bf16.mxu1 %v4445_v37  ;;  %4530 = vmatprep.subr.bf16.mxu0 %v4529_v38  ;;  %v4485_v36 = vpack.c.bf16 %v3166_v33, %v3165_v32 }
 0x20c   :  { %4448 = vmatpush3.bf16.msra.mxu1 %v4445_v37  ;;  %4532 = vmatpush3.bf16.msra.mxu0 %v4529_v38  ;;  %v4569_v37 = vpack.c.bf16 %v3206_v35, %v3205_v34  ;;  %v1701_v38 = vld [vmem:[%s6065_s8] sm:$0xff] }
 0x20d   :  { %4450 = vmatprep.subr.bf16.mxu1 %v4449_v43  ;;  %4534 = vmatprep.subr.bf16.mxu0 %v4533_v44  ;;  %v1789_v34 = vld [vmem:[%s6066_s9] sm:$0x3] }
 0x20e   :  { %v1867_v35 = vld [vmem:[%s6067_s10] sm:$0xff] }
 0x210   :  { %4452 = vmatpush3.bf16.msra.mxu1 %v4449_v43  ;;  %4536 = vmatpush3.bf16.msra.mxu0 %v4533_v44 }
 0x211   :  { %4454 = vmatprep.subr.bf16.mxu1 %v4453_v49  ;;  %4538 = vmatprep.subr.bf16.mxu0 %v4537_v50 }
 0x214   :  { %4456 = vmatpush3.bf16.msra.mxu1 %v4453_v49  ;;  %4540 = vmatpush3.bf16.msra.mxu0 %v4537_v50 }
 0x215   :  { %4458 = vmatprep.subr.bf16.mxu1 %v4457_v55  ;;  %4542 = vmatprep.subr.bf16.mxu0 %v4541_v56 }
 0x218   :  { %4460 = vmatpush3.bf16.msra.mxu1 %v4457_v55  ;;  %4544 = vmatpush3.bf16.msra.mxu0 %v4541_v56 }
 0x219   :  { %4462 = vmatprep.subr.bf16.mxu1 %v4461_v61  ;;  %4546 = vmatprep.subr.bf16.mxu0 %v4545_v62 }
 0x21b   :  { %3874 = vmatmul.mubr.msk.f32.vlgmr.msra.gmra.mrb[8].mxu1 %vm1054_vm9, %v5297_v3  ;;  %3976 = vmatmul.mubr.msk.f32.vlgmr.msra.gmra.mrb[12].mxu0 %vm1054_vm9, %v5297_v3  ;;  %v4469_v3 = vpack.c.bf16 %v3158_v7, %v3157_v6  ;;  %v1702_v7 = vld [vmem:[%s6065_s8 + $0x8] sm:$0x3f] }
 0x21c   :  { %3876 = vmatprep.mubr.msk.f32.mxu1 %vm1054_vm9, %v5323_v18  ;;  %4464 = vmatpush3.bf16.msra.mxu1 %v4461_v61 }
 0x21d   :  { %3978 = vmatprep.mubr.msk.f32.mxu0 %vm1054_vm9, %v5323_v18  ;;  %4548 = vmatpush3.bf16.msra.mxu0 %v4545_v62  ;;  %v4473_v18 = vpack.c.bf16 %v3160_v13, %v3159_v12  ;;  %v3222_v13 = vld [vmem:[%s6067_s10 + $0x80] sm:$0xff] }
 0x21e   :  { %4466 = vmatprep.subr.bf16.mxu1 %v4465_v4  ;;  %4550 = vmatprep.subr.bf16.mxu0 %v4549_v5 }
 0x21f   :  { %3877 = vmatmul.mubr.msk.f32.gmra.mrb[10].mxu1 %vm1054_vm9, %v5304_v10  ;;  %3979 = vmatmul.mubr.msk.f32.gmra.mrb[14].mxu0 %vm1054_vm9, %v5304_v10  ;;  %v4557_v10 = vpack.c.bf16 %v3200_v16, %v3199_v14  ;;  %v3223_v14 = vld [vmem:[%s6067_s10 + $0x88] sm:$0xff] }
 0x220   :  { %4468 = vmatpush3.bf16.msra.mxu1 %v4465_v4  ;;  %3907 = vmatprep.mubr.msk.f32.mxu1 %vm1054_vm9, %v5317_v15  ;;  %v4595_v16 = vpack.c.bf16 %v3223_v14, %v3222_v13  ;;  %v3243_v13 = vld [vmem:[%s6067_s10 + $0x100] sm:$0xff]  ;;  %v3244_v14 = vld [vmem:[%s6067_s10 + $0x108] sm:$0xff] }
 0x221   :  { %4552 = vmatpush3.bf16.msra.mxu0 %v4549_v5  ;;  %4009 = vmatprep.mubr.msk.f32.mxu0 %vm1054_vm9, %v5317_v15  ;;  %v3202_v15 = vld [vmem:[%s6062_s5 + $0x128] sm:$0xff] }
 0x222   :  { %4470 = vmatprep.subr.bf16.mxu1 %v4469_v3  ;;  %4554 = vmatprep.subr.bf16.mxu0 %v4553_v11  ;;  %v4561_v23 = vpack.c.bf16 %v3202_v15, %v3201_v21  ;;  %v3227_v21 = vld [vmem:[%s6067_s10 + $0xa8] sm:$0xff] }
 0x223   :  { %v4601_v15 = vpack.c.bf16 %v3227_v21, %v3226_v20  ;;  %v3245_v20 = vld [vmem:[%s6067_s10 + $0x110] sm:$0xff]  ;;  %v3246_v21 = vld [vmem:[%s6067_s10 + $0x118] sm:$0xff] }
 0x224   :  { %4472 = vmatpush3.bf16.msra.mxu1 %v4469_v3  ;;  %v3220_v3 = vld [vmem:[%s6067_s10 + $0x70] sm:$0xff] }
 0x225   :  { %4556 = vmatpush3.bf16.msra.mxu0 %v4553_v11  ;;  %4474 = vmatprep.subr.bf16.mxu1 %v4473_v18  ;;  %v3221_v11 = vld [vmem:[%s6067_s10 + $0x78] sm:$0xff] }
 0x226   :  { %4558 = vmatprep.subr.bf16.mxu0 %v4557_v10  ;;  %v4592_v12 = vpack.c.bf16 %v3221_v11, %v3220_v3  ;;  %v3259_v11 = vld [vmem:[%s6067_s10 + $0x160] sm:$0xff] }
 0x228   :  { %4476 = vmatpush3.bf16.msra.mxu1 %v4473_v18  ;;  %v3224_v18 = vld [vmem:[%s6067_s10 + $0x90] sm:$0xff] }
 0x229   :  { %4560 = vmatpush3.bf16.msra.mxu0 %v4557_v10  ;;  %4478 = vmatprep.subr.bf16.mxu1 %v4477_v22  ;;  %v3225_v10 = vld [vmem:[%s6067_s10 + $0x98] sm:$0xff] }
 0x22a   :  { %4562 = vmatprep.subr.bf16.mxu0 %v4561_v23  ;;  %v4598_v19 = vpack.c.bf16 %v3225_v10, %v3224_v18  ;;  %v4644_v18 = vpack.c.bf16 %v3244_v14, %v3243_v13  ;;  %v3261_v10 = vld [vmem:[%s6067_s10 + $0x170] sm:$0xff]  ;;  %v3282_v13 = vld [vmem:[%s6067_s10 + $0x1f8] sm:$0xff] }
 0x22c   :  { %4480 = vmatpush3.bf16.msra.mxu1 %v4477_v22  ;;  %v3228_v22 = vld [vmem:[%s6067_s10 + $0xb0] sm:$0xff] }
 0x22d   :  { %4564 = vmatpush3.bf16.msra.mxu0 %v4561_v23  ;;  %4482 = vmatprep.subr.bf16.mxu1 %v4481_v30  ;;  %v3229_v23 = vld [vmem:[%s6067_s10 + $0xb8] sm:$0xff] }
 0x22e   :  { %4566 = vmatprep.subr.bf16.mxu0 %v4565_v31  ;;  %v4604_v24 = vpack.c.bf16 %v3229_v23, %v3228_v22  ;;  %v4647_v22 = vpack.c.bf16 %v3246_v21, %v3245_v20  ;;  %v3263_v23 = vld [vmem:[%s6067_s10 + $0x180] sm:$0xff]  ;;  %v3284_v20 = vld [vmem:[%s6067_s10 + $0x208] sm:$0xff] }
 0x230   :  { %4484 = vmatpush3.bf16.msra.mxu1 %v4481_v30 }
 0x231   :  { %4568 = vmatpush3.bf16.msra.mxu0 %v4565_v31  ;;  %4486 = vmatprep.subr.bf16.mxu1 %v4485_v36 }
 0x232   :  { %4570 = vmatprep.subr.bf16.mxu0 %v4569_v37 }
 0x234   :  { %4488 = vmatpush3.bf16.msra.mxu1 %v4485_v36  ;;  %v1868_v36 = vld [vmem:[%s6067_s10 + $0x8] sm:$0xff] }
 0x235   :  { %4572 = vmatpush3.bf16.msra.mxu0 %v4569_v37  ;;  %v3217_v37 = vld [vmem:[%s6066_s9 + $0x2] sm:$0x3] }
 0x236   :  { %4591 = vmatprep.subr.bf16.mxu0 %v4860_v8 }
 0x237   :  { %3908 = vmatmul.mubr.msk.f32.vlgmr.msra.gmra.mrb[8].mxu1 %vm1054_vm9, %v5335_v26 }
 0x238   :  { %4010 = vmatmul.mubr.msk.f32.vlgmr.msra.gmra.mrb[12].mxu0 %vm1054_vm9, %v5335_v26  ;;  %3910 = vmatprep.mubr.msk.f32.mxu1 %vm1054_vm9, %v5339_v27 }
 0x239   :  { %4012 = vmatprep.mubr.msk.f32.mxu0 %vm1054_vm9, %v5339_v27  ;;  %4593 = vmatpush3.bf16.msra.mxu0 %v4592_v12  ;;  %v3260_v12 = vld [vmem:[%s6067_s10 + $0x168] sm:$0xff] }
 0x23a   :  { %4594 = vmatprep.subr.bf16.mxu0 %v4860_v8 }
 0x23b   :  { %3911 = vmatmul.mubr.msk.f32.gmra.mrb[10].mxu1 %vm1054_vm9, %v5321_v17 }
 0x23c   :  { %4013 = vmatmul.mubr.msk.f32.gmra.mrb[14].mxu0 %vm1054_vm9, %v5321_v17  ;;  %4023 = vmatprep.mubr.msk.f32.mxu1 %vm1703_vm10, %v1701_v38  ;;  %v4613_v38 = vpack.c.bf16 %v1868_v36, %v1867_v35  ;;  %v3249_v35 = vld [vmem:[%s6067_s10 + $0x130] sm:$0xff]  ;;  %v3250_v36 = vld [vmem:[%s6067_s10 + $0x138] sm:$0xff] }
 0x23d   :  { %4068 = vmatprep.mubr.msk.f32.mxu0 %vm4861_vm13, %v4862_v9  ;;  %4596 = vmatpush3.bf16.msra.mxu0 %v4595_v16  ;;  %v4666_v16 = vpack.c.bf16 %v3260_v12, %v3259_v11  ;;  %v3298_v11 = vld [vmem:[%s6067_s10 + $0x258] sm:$0xff]  ;;  %v3281_v12 = vld [vmem:[%s6067_s10 + $0x1f0] sm:$0xff] }
 0x23e   :  { %4597 = vmatprep.subr.bf16.mxu0 %v4860_v8 }
 0x241   :  { %4599 = vmatpush3.bf16.msra.mxu0 %v4598_v19  ;;  %v3262_v19 = vld [vmem:[%s6067_s10 + $0x178] sm:$0xff] }
 0x242   :  { %4600 = vmatprep.subr.bf16.mxu0 %v4860_v8 }
 0x245   :  { %4602 = vmatpush3.bf16.msra.mxu0 %v4601_v15  ;;  %v4669_v15 = vpack.c.bf16 %v3262_v19, %v3261_v10  ;;  %v3300_v10 = vld [vmem:[%s6067_s10 + $0x268] sm:$0xff]  ;;  %v3283_v19 = vld [vmem:[%s6067_s10 + $0x200] sm:$0xff] }
 0x246   :  { %4603 = vmatprep.subr.bf16.mxu0 %v4860_v8 }
 0x249   :  { %4605 = vmatpush3.bf16.msra.mxu0 %v4604_v24  ;;  %v3264_v24 = vld [vmem:[%s6067_s10 + $0x188] sm:$0xff] }
 0x24a   :  { %4606 = vmatprep.subr.bf16.mxu0 %v4860_v8 }
 0x24d   :  { %4608 = vmatpush3.bf16.msra.mxu0 %v4607_v29  ;;  %v4672_v29 = vpack.c.bf16 %v3264_v24, %v3263_v23  ;;  %v3302_v23 = vld [vmem:[%s6067_s10 + $0x278] sm:$0xff]  ;;  %v3285_v24 = vld [vmem:[%s6067_s10 + $0x210] sm:$0xff] }
 0x24e   :  { %4609 = vmatprep.subr.bf16.mxu0 %v4860_v8 }
 0x30a   :  { %v3909_v26 = vpop.f32.mrb[8].mxu1 }
 0x30b   :  { %v4011_v39 = vpop.f32.mrb[12].mxu0  ;;  %v1337_v27 = vpop.f32.mrb[9].mxu1 }
 0x30c   :  { %v1664_v41 = vmax.f32 %v3909_v26, %v4011_v39  ;;  %v1640_v42 = vpop.f32.mrb[13].mxu0  ;;  %v1869_v26 = vld [vmem:[%s6067_s10 + $0x10] sm:$0xff]  ;;  %v1870_v39 = vld [vmem:[%s6067_s10 + $0x18] sm:$0xff] }
 0x30d   :  { %v1663_v43 = vmax.f32 %v1337_v27, %v1640_v42  ;;  %v1871_v27 = vld [vmem:[%s6067_s10 + $0x20] sm:$0xff] }
 0x30e   :  { %v1675_v44 = vadd.f32 %v3211_v40, %v1664_v41  ;;  %v3912_v45 = vpop.f32.mrb[10].mxu1  ;;  %v1872_v41 = vld [vmem:[%s6067_s10 + $0x28] sm:$0xff] }
 0x30f   :  { %v1674_v17 = vadd.f32 %v3211_v40, %v1663_v43  ;;  %v4014_v46 = vpop.f32.mrb[14].mxu0  ;;  %v1347_v47 = vpop.f32.mrb[11].mxu1  ;;  %v4619_v42 = vpack.c.bf16 %v1872_v41, %v1871_v27  ;;  %v1873_v43 = vld [vmem:[%s6067_s10 + $0x30] sm:$0xff]  ;;  %v3268_v41 = vld [vmem:[%s6067_s10 + $0x1a8] sm:$0xff] }
 0x310   :  { %v1679_v48 = vmax.f32 %v1675_v44, 0.0  ;;  %v1666_v49 = vmax.f32 %v3912_v45, %v4014_v46  ;;  %v1650_v50 = vpop.f32.mrb[15].mxu0  ;;  %v1874_v44 = vld [vmem:[%s6067_s10 + $0x38] sm:$0xff]  ;;  %v1876_v46 = vld [vmem:[%s6067_s10 + $0x48] sm:$0xff] }
 0x311   :  { %v1678_v51 = vmax.f32 %v1674_v17, 0.0  ;;  %v1665_v52 = vmax.f32 %v1347_v47, %v1650_v50  ;;  %v4622_v45 = vpack.c.bf16 %v1874_v44, %v1873_v43  ;;  %v1875_v17 = vld [vmem:[%s6067_s10 + $0x40] sm:$0xff]  ;;  %v3269_v43 = vld [vmem:[%s6067_s10 + $0x1b0] sm:$0xff]  ;;  %v3270_v44 = vld [vmem:[%s6067_s10 + $0x1b8] sm:$0xff] }
 0x312   :  { %v1687_v53 = vrot.slane %v1679_v48, 1  ;;  %v1677_v54 = vadd.f32 %v3211_v40, %v1666_v49  ;;  %v4625_v47 = vpack.c.bf16 %v1876_v46, %v1875_v17  ;;  %v1878_v49 = vld [vmem:[%s6067_s10 + $0x58] sm:$0xff] }
 0x313   :  { %v1686_v55 = vrot.slane %v1678_v51, 1  ;;  %v1676_v56 = vadd.f32 %v3211_v40, %v1665_v52  ;;  %v4616_v40 = vpack.c.bf16 %v1870_v39, %v1869_v26  ;;  %v1880_v52 = vld [vmem:[%s6067_s10 + $0x68] sm:$0xff]  ;;  %v3251_v26 = vld [vmem:[%s6067_s10 + $0x140] sm:$0xff] }
 0x314   :  { %v1681_v57 = vmax.f32 %v1677_v54, 0.0  ;;  %v3232_v54 = vld [vmem:[%s6067_s10 + $0xd0] sm:$0xff]  ;;  %v3252_v39 = vld [vmem:[%s6067_s10 + $0x148] sm:$0xff] }
 0x315   :  { %v1688_v58 = vsel %vm73_vm3, %v1686_v55, %v1687_v53  ;;  %v1680_v59 = vmax.f32 %v1676_v56, 0.0  ;;  %v3233_v55 = vld [vmem:[%s6067_s10 + $0xd8] sm:$0xff]  ;;  %v4656_v27 = vpack.c.bf16 %v3252_v39, %v3251_v26 }
 0x316   :  { %v1697_v60 = vmax.f32 %v1678_v51, %v1688_v58  ;;  %v1691_v61 = vrot.slane %v1681_v57, 1  ;;  %v1879_v51 = vld [vmem:[%s6067_s10 + $0x60] sm:$0xff]  ;;  %v4610_v56 = vpack.c.bf16 %v3233_v55, %v3232_v54  ;;  %v3272_v54 = vld [vmem:[%s6066_s9 + $0x8] sm:$0x3]  ;;  %v3306_v26 = vld [vmem:[%s6067_s10 + $0x298] sm:$0xff] }
 0x317   :  { %v1689_v62 = vrot.slane %v1680_v59, 1  ;;  %v3239_v58 = vld [vmem:[%s6067_s10 + $0xe0] sm:$0xff] }
 0x318   :  { %v1700_v1 = vmax.f32 %v1681_v57, %v1691_v61  ;;  %4611 = vmatpush3.bf16.msra.mxu0 %v4610_v56  ;;  %v3293_v56 = vld [vmem:[%s6067_s10 + $0x230] sm:$0xff] }
 0x319   :  { %v1692_v63 = vsel %vm73_vm3, %v1689_v62, %v1691_v61  ;;  %v1690_v0 = vsel %vm73_vm3, %v1687_v53, %v1689_v62  ;;  %v4631_v53 = vpack.c.bf16 %v1880_v52, %v1879_v51  ;;  %4658 = vmatprep.subr.bf16.mxu0 %v4860_v8  ;;  %v3236_v61 = vld [vmem:[%s6066_s9 + $0x4] sm:$0x3] }
 0x31a   :  { %v1699_v2 = vmax.f32 %v1680_v59, %v1692_v63  ;;  %v1698_v4 = vmax.f32 %v1679_v48, %v1690_v0  ;;  %v1877_v48 = vld [vmem:[%s6067_s10 + $0x50] sm:$0xff]  ;;  %v3240_v59 = vld [vmem:[%s6067_s10 + $0xe8] sm:$0xff]  ;;  %v3258_v0 = vld [vmem:[%s6067_s10 + $0x158] sm:$0xff] }
 0x31b   :  { %v4628_v50 = vpack.c.bf16 %v1878_v49, %v1877_v48  ;;  %v4638_v62 = vpack.c.bf16 %v3240_v59, %v3239_v58  ;;  %v3257_v63 = vld [vmem:[%s6067_s10 + $0x150] sm:$0xff]  ;;  %v3275_v49 = vld [vmem:[%s6067_s10 + $0x1c0] sm:$0xff] }
 0x31c   :  { %v4577_v5 = vpack.c.bf16 %v1700_v1, %v1699_v2  ;;  %v4573_v6 = vpack.c.bf16 %v1698_v4, %v1697_v60  ;;  %v3241_v2 = vld [vmem:[%s6067_s10 + $0xf0] sm:$0xff]  ;;  %v3242_v4 = vld [vmem:[%s6067_s10 + $0xf8] sm:$0xff] }
 0x31d   :  { %v4641_v3 = vpack.c.bf16 %v3242_v4, %v3241_v2  ;;  %v3277_v59 = vld [vmem:[%s6067_s10 + $0x1d0] sm:$0xff]  ;;  %v3296_v2 = vld [vmem:[%s6067_s10 + $0x248] sm:$0xff]  ;;  %v3279_v4 = vld [vmem:[%s6067_s10 + $0x1e0] sm:$0xff] }
 0x31e   :  { %4574 = vmatprep.subr.bf16.mxu1 %v4573_v6 }
 0x31f   :  { %4576 = vmatpush3.bf16.msra.mxu1 %v4573_v6  ;;  %v3254_v6 = vld [vmem:[%s6066_s9 + $0x6] sm:$0x3] }
 0x320   :  { %4579 = vmatprep.subr.msk.bf16.mxu1 %vm4578_vm12, %v4577_v5 }
 0x323   :  { %4582 = vmatpush3.bf16.msk.msra.mxu1 %vm4578_vm12, %v4577_v5 }
 0x324   :  { %4583 = vmatprep.subr.bf16.mxu1 %v4860_v8 }
 0x326   :  { %4024 = vmatmul.mubr.msk.f32.vlgmr.msra.gmra.mrb[12].mxu1 %vm1703_vm10, %v1702_v7  ;;  %v4663_v7 = vpack.c.bf16 %v3258_v0, %v3257_v63 }
 0x327   :  { %4030 = vmatprep.mubr.msk.f32.mxu1 %vm4861_vm13, %v4862_v9 }
 0x3f9   :  { %v4025_v30 = vpop.f32.mrb[12].mxu1 }
 0x3fa   :  { %v1780_v31 = vpop.f32.mrb[13].mxu1 }
 0x3fb   :  { %v5587_v33 = vpack.c.bf16 %v4025_v30, %v1780_v31  ;;  %v4650_v30 = vpack.c.bf16 %v3248_v28, %v3247_v25  ;;  %v3265_v31 = vld [vmem:[%s6067_s10 + $0x190] sm:$0xff]  ;;  %v3286_v25 = vld [vmem:[%s6067_s10 + $0x218] sm:$0xff] }
 0x3fd   :  { %4586 = vmatpush3.bf16.msk.msra.mxu1 %vm5583_vm14, %v5587_v33 }
 0x3fe   :  { %4587 = vmatprep.subr.bf16.mxu1 %v4860_v8 }
 0x400   :  { %4031 = vmatmul.mubr.msk.f32.vlgmr.msra.gmra.mrb[14].mxu1 %vm1790_vm15, %v1789_v34  ;;  %v3266_v34 = vld [vmem:[%s6067_s10 + $0x198] sm:$0xff] }
 0x401   :  { %4590 = vmatpush3.bf16.msk.msra.mxu1 %vm5583_vm14, %v5587_v33  ;;  %4037 = vmatprep.mubr.msk.f32.mxu1 %vm4861_vm13, %v4862_v9 }
 0x402   :  { %4612 = vmatprep.subr.bf16.mxu1 %v4860_v8 }
 0x404   :  { %4038 = vmatmul.mubr.msk.f32.vlgmr.msra.gmra.mrb[16].mxu1 %vm1790_vm15, %v3217_v37  ;;  %v4675_v37 = vpack.c.bf16 %v3266_v34, %v3265_v31  ;;  %v3288_v31 = vld [vmem:[%s6067_s10 + $0x228] sm:$0xff] }
 0x405   :  { %4614 = vmatpush3.bf16.msra.mxu1 %v4613_v38  ;;  %4099 = vmatprep.mubr.msk.f32.mxu1 %vm4861_vm13, %v4862_v9  ;;  %v4653_v38 = vpack.c.bf16 %v3250_v36, %v3249_v35  ;;  %v3303_v35 = vld [vmem:[%s6067_s10 + $0x280] sm:$0xff]  ;;  %v3304_v36 = vld [vmem:[%s6067_s10 + $0x288] sm:$0xff] }
 0x406   :  { %4615 = vmatprep.subr.bf16.mxu1 %v4860_v8 }
 0x409   :  { %4617 = vmatpush3.bf16.msra.mxu1 %v4616_v40  ;;  %v3267_v40 = vld [vmem:[%s6067_s10 + $0x1a0] sm:$0xff] }
 0x40a   :  { %4618 = vmatprep.subr.bf16.mxu1 %v4860_v8 }
 0x40d   :  { %4620 = vmatpush3.bf16.msra.mxu1 %v4619_v42  ;;  %v4678_v42 = vpack.c.bf16 %v3268_v41, %v3267_v40 }
 0x40e   :  { %4621 = vmatprep.subr.bf16.mxu1 %v4860_v8 }
 0x411   :  { %4623 = vmatpush3.bf16.msra.mxu1 %v4622_v45  ;;  %v4681_v45 = vpack.c.bf16 %v3270_v44, %v3269_v43  ;;  %v3312_v43 = vld [vmem:[%s6067_s10 + $0x2a8] sm:$0xff] }
 0x412   :  { %4624 = vmatprep.subr.bf16.mxu1 %v4860_v8 }
 0x415   :  { %4626 = vmatpush3.bf16.msra.mxu1 %v4625_v47 }
 0x416   :  { %4627 = vmatprep.subr.bf16.mxu1 %v4860_v8 }
 0x419   :  { %4629 = vmatpush3.bf16.msra.mxu1 %v4628_v50  ;;  %v3276_v50 = vld [vmem:[%s6067_s10 + $0x1c8] sm:$0xff] }
 0x41a   :  { %4630 = vmatprep.subr.bf16.mxu1 %v4860_v8  ;;  %v4688_v55 = vpack.c.bf16 %v3276_v50, %v3275_v49  ;;  %v3313_v50 = vld [vmem:[%s6067_s10 + $0x2b0] sm:$0xff] }
 0x41d   :  { %4632 = vmatpush3.bf16.msra.mxu1 %v4631_v53 }
 0x41e   :  { %4633 = vmatprep.subr.bf16.mxu1 %v4860_v8 }
 0x4d3   :  { %v1863_v57 = vpop.f32.mrb[14].mxu1 }
 0x4d4   :  { %v4032_v60 = vpop.f32.mrb[15].mxu1  ;;  %4100 = vmatmul.mubr.msk.f32.vlgmr.msra.gmra.mrb[18].mxu1 %vm1054_vm9, %v1863_v57  ;;  %v3294_v57 = vld [vmem:[%s6067_s10 + $0x238] sm:$0xff] }
 0x4d5   :  { %4636 = vmatpush3.bf16.msk.msra.mxu1 %vm5583_vm14, %v5587_v33  ;;  %4106 = vmatprep.mubr.msk.f32.mxu1 %vm4861_vm13, %v4862_v9  ;;  %v3278_v60 = vld [vmem:[%s6067_s10 + $0x1d8] sm:$0xff]  ;;  %v4713_v63 = vpack.c.bf16 %v3294_v57, %v3293_v56  ;;  %v3317_v56 = vld [vmem:[%s6067_s10 + $0x2d0] sm:$0xff] }
 0x4d6   :  { %4637 = vmatprep.subr.bf16.mxu1 %v4860_v8  ;;  %v4691_v0 = vpack.c.bf16 %v3278_v60, %v3277_v59  ;;  %v3318_v57 = vld [vmem:[%s6067_s10 + $0x2d8] sm:$0xff]  ;;  %v3320_v59 = vld [vmem:[%s6067_s10 + $0x2e8] sm:$0xff] }
 0x4d7   :  { %v1952_v1 = vpop.f32.mrb[16].mxu1 }
 0x4d8   :  { %4069 = vmatmul.mubr.msk.f32.vlgmr.msra.gmra.mrb[16].mxu0 %vm1054_vm9, %v1952_v1  ;;  %4107 = vmatmul.mubr.msk.f32.vlgmr.msra.gmra.mrb[20].mxu1 %vm1790_vm15, %v3236_v61  ;;  %v4039_v5 = vpop.f32.mrb[17].mxu1  ;;  %v3295_v1 = vld [vmem:[%s6067_s10 + $0x240] sm:$0xff] }
 0x4d9   :  { %4661 = vmatpush3.bf16.msk.msra.mxu0 %vm5583_vm14, %v5587_v33  ;;  %4144 = vmatprep.mubr.msk.f32.mxu0 %vm4861_vm13, %v4862_v9  ;;  %v3280_v5 = vld [vmem:[%s6067_s10 + $0x1e8] sm:$0xff] }
 0x4da   :  { %4639 = vmatpush3.bf16.msra.mxu1 %v4638_v62  ;;  %4662 = vmatprep.subr.bf16.mxu0 %v4860_v8  ;;  %v3290_v62 = vld [vmem:[%s6066_s9 + $0xa] sm:$0x3] }
 0x4db   :  { %4640 = vmatprep.subr.bf16.mxu1 %v4860_v8  ;;  %4137 = vmatprep.mubr.msk.f32.mxu1 %vm4861_vm13, %v4862_v9 }
 0x4dc   :  { %4145 = vmatmul.mubr.msk.f32.vlgmr.msra.gmra.mrb[18].mxu0 %vm1790_vm15, %v3254_v6  ;;  %v4716_v6 = vpack.c.bf16 %v3296_v2, %v3295_v1  ;;  %v3324_v1 = vld [vmem:[%s6067_s10 + $0x308] sm:$0xff] }
 0x4dd   :  { %4664 = vmatpush3.bf16.msra.mxu0 %v4663_v7  ;;  %4175 = vmatprep.mubr.msk.f32.mxu0 %vm4861_vm13, %v4862_v9  ;;  %v4694_v7 = vpack.c.bf16 %v3280_v5, %v3279_v4  ;;  %v2946_v4 = vld [vmem:[%s6069_s12] sm:$0xff]  ;;  %v2947_v5 = vld [vmem:[%s6069_s12 + $0x8] sm:$0xff] }
 0x4de   :  { %4642 = vmatpush3.bf16.msra.mxu1 %v4641_v3  ;;  %4665 = vmatprep.subr.bf16.mxu0 %v4860_v8  ;;  %v3297_v3 = vld [vmem:[%s6067_s10 + $0x250] sm:$0xff] }
 0x4df   :  { %4643 = vmatprep.subr.bf16.mxu1 %v4860_v8  ;;  %v4719_v14 = vpack.c.bf16 %v3298_v11, %v3297_v3  ;;  %v2949_v3 = vld [vmem:[%s6069_s12 + $0x18] sm:$0xff] }
 0x4e1   :  { %4667 = vmatpush3.bf16.msra.mxu0 %v4666_v16  ;;  %v4697_v16 = vpack.c.bf16 %v3282_v13, %v3281_v12  ;;  %v2950_v12 = vld [vmem:[%s6069_s12 + $0x20] sm:$0xff]  ;;  %v2951_v13 = vld [vmem:[%s6069_s12 + $0x28] sm:$0xff] }
 0x4e2   :  { %4645 = vmatpush3.bf16.msra.mxu1 %v4644_v18  ;;  %4668 = vmatprep.subr.bf16.mxu0 %v4860_v8  ;;  %v3299_v18 = vld [vmem:[%s6067_s10 + $0x260] sm:$0xff] }
 0x4e3   :  { %4646 = vmatprep.subr.bf16.mxu1 %v4860_v8  ;;  %v4722_v21 = vpack.c.bf16 %v3300_v10, %v3299_v18  ;;  %v2953_v18 = vld [vmem:[%s6069_s12 + $0x38] sm:$0xff] }
 0x4e5   :  { %4670 = vmatpush3.bf16.msra.mxu0 %v4669_v15  ;;  %v4700_v15 = vpack.c.bf16 %v3284_v20, %v3283_v19  ;;  %v2954_v19 = vld [vmem:[%s6069_s12 + $0x40] sm:$0xff]  ;;  %v2955_v20 = vld [vmem:[%s6069_s12 + $0x48] sm:$0xff] }
 0x4e6   :  { %4648 = vmatpush3.bf16.msra.mxu1 %v4647_v22  ;;  %4671 = vmatprep.subr.bf16.mxu0 %v4860_v8  ;;  %v3301_v22 = vld [vmem:[%s6067_s10 + $0x270] sm:$0xff] }
 0x4e7   :  { %4649 = vmatprep.subr.bf16.mxu1 %v4860_v8  ;;  %v4725_v28 = vpack.c.bf16 %v3302_v23, %v3301_v22  ;;  %v2957_v22 = vld [vmem:[%s6069_s12 + $0x58] sm:$0xff] }
 0x4e9   :  { %4673 = vmatpush3.bf16.msra.mxu0 %v4672_v29  ;;  %v4703_v29 = vpack.c.bf16 %v3286_v25, %v3285_v24 }
 0x4ea   :  { %4651 = vmatpush3.bf16.msra.mxu1 %v4650_v30  ;;  %4674 = vmatprep.subr.bf16.mxu0 %v4860_v8  ;;  %v3287_v30 = vld [vmem:[%s6067_s10 + $0x220] sm:$0xff] }
 0x4eb   :  { %4652 = vmatprep.subr.bf16.mxu1 %v4860_v8  ;;  %v4706_v34 = vpack.c.bf16 %v3288_v31, %v3287_v30 }
 0x4ed   :  { %4676 = vmatpush3.bf16.msra.mxu0 %v4675_v37  ;;  %v4728_v37 = vpack.c.bf16 %v3304_v36, %v3303_v35  ;;  %v2958_v36 = vld [vmem:[%s6069_s12 + $0x60] sm:$0xff] }
 0x4ee   :  { %4654 = vmatpush3.bf16.msra.mxu1 %v4653_v38  ;;  %4677 = vmatprep.subr.bf16.mxu0 %v4860_v8  ;;  %v3305_v38 = vld [vmem:[%s6067_s10 + $0x290] sm:$0xff] }
 0x4ef   :  { %4655 = vmatprep.subr.bf16.mxu1 %v4860_v8  ;;  %v4731_v39 = vpack.c.bf16 %v3306_v26, %v3305_v38  ;;  %v2960_v26 = vld [vmem:[%s6069_s12 + $0x70] sm:$0xff] }
 0x4f1   :  { %4679 = vmatpush3.bf16.msra.mxu0 %v4678_v42  ;;  %v3311_v42 = vld [vmem:[%s6067_s10 + $0x2a0] sm:$0xff] }
 0x4f2   :  { %4657 = vmatpush3.bf16.msra.mxu1 %v4656_v27  ;;  %4680 = vmatprep.subr.bf16.mxu0 %v4860_v8  ;;  %v4738_v49 = vpack.c.bf16 %v3312_v43, %v3311_v42 }
 0x4f3   :  { %4683 = vmatprep.subr.bf16.mxu1 %v4860_v8 }
 0x4f5   :  { %4682 = vmatpush3.bf16.msra.mxu0 %v4681_v45 }
 0x4f6   :  { %4708 = vmatprep.subr.bf16.mxu0 %v4860_v8 }
 0x5a7   :  { %v2113_v17 = vpop.f32.mrb[18].mxu1 }
 0x5a8   :  { %v4101_v46 = vpop.f32.mrb[19].mxu1 }
 0x5ab   :  { %v2040_v47 = vpop.f32.mrb[16].mxu0  ;;  %v2188_v48 = vpop.f32.mrb[20].mxu1 }
 0x5ac   :  { %v5795_v51 = vadd.f32 %v2113_v17, %v2040_v47  ;;  %v4108_v52 = vpop.f32.mrb[21].mxu1  ;;  %4138 = vmatmul.mubr.msk.f32.vlgmr.msra.gmra.mrb[22].mxu1 %vm1054_vm9, %v2188_v48  ;;  %v4070_v53 = vpop.f32.mrb[17].mxu0  ;;  %v3308_v48 = vld [vmem:[%s6066_s9 + $0xc] sm:$0x3] }
 0x5ad   :  { %4686 = vmatpush3.bf16.msk.msra.mxu1 %vm5583_vm14, %v5587_v33  ;;  %4182 = vmatprep.mubr.msk.f32.mxu1 %vm4861_vm13, %v4862_v9  ;;  %v3315_v53 = vld [vmem:[%s6067_s10 + $0x2c0] sm:$0xff] }
 0x5ae   :  { %4687 = vmatprep.subr.bf16.mxu1 %v4860_v8 }
 0x5af   :  { %v2352_v58 = vpop.f32.mrb[18].mxu0 }
 0x5b0   :  { %4176 = vmatmul.mubr.msk.f32.vlgmr.msra.gmra.mrb[20].mxu0 %vm1054_vm9, %v2352_v58  ;;  %4183 = vmatmul.mubr.msk.f32.vlgmr.msra.gmra.mrb[24].mxu1 %vm1790_vm15, %v3272_v54  ;;  %v4146_v61 = vpop.f32.mrb[19].mxu0  ;;  %v3316_v54 = vld [vmem:[%s6067_s10 + $0x2c8] sm:$0xff]  ;;  %v4747_v58 = vpack.c.bf16 %v3318_v57, %v3317_v56 }
 0x5b1   :  { %4711 = vmatpush3.bf16.msk.msra.mxu0 %vm5583_vm14, %v5587_v33  ;;  %4220 = vmatprep.mubr.msk.f32.mxu0 %vm4861_vm13, %v4862_v9  ;;  %v3321_v61 = vld [vmem:[%s6067_s10 + $0x2f0] sm:$0xff] }
 0x5b2   :  { %4689 = vmatpush3.bf16.msra.mxu1 %v4688_v55  ;;  %4712 = vmatprep.subr.bf16.mxu0 %v4860_v8  ;;  %v4744_v55 = vpack.c.bf16 %v3316_v54, %v3315_v53 }
 0x5b3   :  { %4690 = vmatprep.subr.bf16.mxu1 %v4860_v8  ;;  %4213 = vmatprep.mubr.msk.f32.mxu1 %vm4861_vm13, %v4862_v9 }
 0x5b4   :  { %4221 = vmatmul.mubr.msk.f32.vlgmr.msra.gmra.mrb[22].mxu0 %vm1790_vm15, %v3290_v62  ;;  %v3322_v62 = vld [vmem:[%s6067_s10 + $0x2f8] sm:$0xff] }
 0x5b5   :  { %4714 = vmatpush3.bf16.msra.mxu0 %v4713_v63  ;;  %4251 = vmatprep.mubr.msk.f32.mxu0 %vm4861_vm13, %v4862_v9  ;;  %v4753_v63 = vpack.c.bf16 %v3322_v62, %v3321_v61 }
 0x5b6   :  { %4692 = vmatpush3.bf16.msra.mxu1 %v4691_v0  ;;  %4715 = vmatprep.subr.bf16.mxu0 %v4860_v8  ;;  %v3323_v0 = vld [vmem:[%s6067_s10 + $0x300] sm:$0xff] }
 0x5b7   :  { %4693 = vmatprep.subr.bf16.mxu1 %v4860_v8  ;;  %v4756_v2 = vpack.c.bf16 %v3324_v1, %v3323_v0 }
 0x5b9   :  { %4717 = vmatpush3.bf16.msra.mxu0 %v4716_v6  ;;  %v2948_v6 = vld [vmem:[%s6069_s12 + $0x10] sm:$0xff] }
 0x5ba   :  { %4695 = vmatpush3.bf16.msra.mxu1 %v4694_v7  ;;  %4718 = vmatprep.subr.bf16.mxu0 %v4860_v8  ;;  %v4759_v7 = vpack.c.bf16 %v2947_v5, %v2946_v4  ;;  %v4762_v11 = vpack.c.bf16 %v2949_v3, %v2948_v6 }
 0x5bb   :  { %4696 = vmatprep.subr.bf16.mxu1 %v4860_v8 }
 0x5bd   :  { %4720 = vmatpush3.bf16.msra.mxu0 %v4719_v14  ;;  %v4765_v14 = vpack.c.bf16 %v2951_v13, %v2950_v12 }
 0x5be   :  { %4698 = vmatpush3.bf16.msra.mxu1 %v4697_v16  ;;  %4721 = vmatprep.subr.bf16.mxu0 %v4860_v8  ;;  %v2952_v16 = vld [vmem:[%s6069_s12 + $0x30] sm:$0xff] }
 0x5bf   :  { %4699 = vmatprep.subr.bf16.mxu1 %v4860_v8  ;;  %v4768_v10 = vpack.c.bf16 %v2953_v18, %v2952_v16 }
 0x5c1   :  { %4723 = vmatpush3.bf16.msra.mxu0 %v4722_v21  ;;  %v4771_v21 = vpack.c.bf16 %v2955_v20, %v2954_v19 }
 0x5c2   :  { %4701 = vmatpush3.bf16.msra.mxu1 %v4700_v15  ;;  %4724 = vmatprep.subr.bf16.mxu0 %v4860_v8  ;;  %v2956_v15 = vld [vmem:[%s6069_s12 + $0x50] sm:$0xff] }
 0x5c3   :  { %4702 = vmatprep.subr.bf16.mxu1 %v4860_v8  ;;  %v4774_v23 = vpack.c.bf16 %v2957_v22, %v2956_v15 }
 0x5c5   :  { %4726 = vmatpush3.bf16.msra.mxu0 %v4725_v28 }
 0x5c6   :  { %4704 = vmatpush3.bf16.msra.mxu1 %v4703_v29  ;;  %4727 = vmatprep.subr.bf16.mxu0 %v4860_v8 }
 0x5c7   :  { %4705 = vmatprep.subr.bf16.mxu1 %v4860_v8 }
 0x5c9   :  { %4729 = vmatpush3.bf16.msra.mxu0 %v4728_v37  ;;  %v2959_v37 = vld [vmem:[%s6069_s12 + $0x68] sm:$0xff] }
 0x5ca   :  { %4707 = vmatpush3.bf16.msra.mxu1 %v4706_v34  ;;  %4730 = vmatprep.subr.bf16.mxu0 %v4860_v8  ;;  %v4777_v38 = vpack.c.bf16 %v2959_v37, %v2958_v36 }
 0x5cb   :  { %4733 = vmatprep.subr.bf16.mxu1 %v4860_v8 }
 0x5cd   :  { %4732 = vmatpush3.bf16.msra.mxu0 %v4731_v39  ;;  %v2961_v39 = vld [vmem:[%s6069_s12 + $0x78] sm:$0xff]  ;;  %s4835_s12 = scalar_lea.vmem %s3048_s18, 32 }
 0x5ce   :  { %4758 = vmatprep.subr.bf16.mxu0 %v4860_v8  ;;  %p4836_p0 = scmp.ne.s32.totalorder %s3048_s18, %s4835_s12  ;;  %p4841_p2 = scmp.lt.s32.totalorder %s4835_s12, %s4835_s12 }
 0x5d0   :  { %p4842_p3 = por %p4841_p2, %p4840_p1 }
 0x5d2   :  { %p4843_p4 = pnand %p4842_p3, %p4836_p0 }
 0x67f   :  { %v2276_v40 = vpop.f32.mrb[22].mxu1 }
 0x680   :  { %v2280_v27 = vadd.f32 %v2276_v40, %v5795_v51  ;;  %v4139_v41 = vpop.f32.mrb[23].mxu1  ;;  %v3314_v51 = vld [vmem:[%s6067_s10 + $0x2b8] sm:$0xff]  ;;  %v4780_v40 = vpack.c.bf16 %v2961_v39, %v2960_v26 }
 0x681   :  { %v4741_v52 = vpack.c.bf16 %v3314_v51, %v3313_v50  ;;  %v3326_v41 = vld [vmem:[%s6068_s11] ss:$0 sm:$0xff] }
 0x683   :  { %v2440_v44 = vpop.f32.mrb[20].mxu0  ;;  %v2516_v45 = vpop.f32.mrb[24].mxu1 }
 0x684   :  { %v5922_v17 = vadd.f32 %v2440_v44, %v2280_v27  ;;  %v4184_v46 = vpop.f32.mrb[25].mxu1  ;;  %4214 = vmatmul.mubr.msk.f32.vlgmr.msra.gmra.mrb[26].mxu1 %vm1054_vm9, %v2516_v45  ;;  %v4177_v47 = vpop.f32.mrb[21].mxu0 }
 0x685   :  { %4736 = vmatpush3.bf16.msk.msra.mxu1 %vm5583_vm14, %v5587_v33  ;;  %4258 = vmatprep.mubr.msk.f32.mxu1 %vm4861_vm13, %v4862_v9 }
 0x686   :  { %4737 = vmatprep.subr.bf16.mxu1 %v4860_v8 }
 0x687   :  { %v2680_v32 = vpop.f32.mrb[22].mxu0 }
 0x688   :  { %4252 = vmatmul.mubr.msk.f32.vlgmr.msra.gmra.mrb[24].mxu0 %vm1054_vm9, %v2680_v32  ;;  %4259 = vmatmul.mubr.msk.f32.vlgmr.msra.gmra.mrb[28].mxu1 %vm1790_vm15, %v3308_v48  ;;  %v4222_v33 = vpop.f32.mrb[23].mxu0 }
 0x689   :  { %4739 = vmatpush3.bf16.msra.mxu1 %v4738_v49  ;;  %4289 = vmatprep.mubr.msk.f32.mxu1 %vm4861_vm13, %v4862_v9 }
 0x68a   :  { %4740 = vmatprep.subr.bf16.mxu1 %v4860_v8  ;;  %4324 = vmatprep.mubr.msk.f32.mxu0 %vm4861_vm13, %v4862_v9  ;;  %v3319_v9 = vld [vmem:[%s6067_s10 + $0x2e0] sm:$0xff] }
 0x68b   :  { %v4750_v60 = vpack.c.bf16 %v3320_v59, %v3319_v9  ;;  %4760 = vmatpush3.bf16.msra.mxu0 %v4759_v7 }
 0x68c   :  { %4761 = vmatprep.subr.bf16.mxu0 %v4860_v8 }
 0x68d   :  { %4742 = vmatpush3.bf16.msra.mxu1 %v4741_v52 }
 0x68e   :  { %4743 = vmatprep.subr.bf16.mxu1 %v4860_v8 }
 0x68f   :  { %4763 = vmatpush3.bf16.msra.mxu0 %v4762_v11 }
 0x690   :  { %4764 = vmatprep.subr.bf16.mxu0 %v4860_v8 }
 0x691   :  { %4745 = vmatpush3.bf16.msra.mxu1 %v4744_v55 }
 0x692   :  { %4746 = vmatprep.subr.bf16.mxu1 %v4860_v8 }
 0x693   :  { %4766 = vmatpush3.bf16.msra.mxu0 %v4765_v14 }
 0x694   :  { %4767 = vmatprep.subr.bf16.mxu0 %v4860_v8 }
 0x695   :  { %4748 = vmatpush3.bf16.msra.mxu1 %v4747_v58 }
 0x696   :  { %4749 = vmatprep.subr.bf16.mxu1 %v4860_v8 }
 0x697   :  { %4769 = vmatpush3.bf16.msra.mxu0 %v4768_v10 }
 0x698   :  { %4770 = vmatprep.subr.bf16.mxu0 %v4860_v8 }
 0x699   :  { %4751 = vmatpush3.bf16.msra.mxu1 %v4750_v60 }
 0x69a   :  { %4752 = vmatprep.subr.bf16.mxu1 %v4860_v8 }
 0x69b   :  { %4772 = vmatpush3.bf16.msra.mxu0 %v4771_v21 }
 0x69c   :  { %4773 = vmatprep.subr.bf16.mxu0 %v4860_v8 }
 0x69d   :  { %4754 = vmatpush3.bf16.msra.mxu1 %v4753_v63 }
 0x69e   :  { %4755 = vmatprep.subr.bf16.mxu1 %v4860_v8 }
 0x69f   :  { %4775 = vmatpush3.bf16.msra.mxu0 %v4774_v23 }
 0x6a0   :  { %4776 = vmatprep.subr.bf16.mxu0 %v4860_v8 }
 0x6a1   :  { %4757 = vmatpush3.bf16.msra.mxu1 %v4756_v2 }
 0x6a3   :  { %4778 = vmatpush3.bf16.msra.mxu0 %v4777_v38 }
 0x6a4   :  { %4779 = vmatprep.subr.bf16.mxu0 %v4860_v8  ;;  %v3327_v8 = vld [vmem:[%s6070_s13] ss:$0 sm:$0xff] }
 0x6a7   :  { %4781 = vmatpush3.bf16.msra.mxu0 %v4780_v40 }
 0x757   :  { %v2604_v24 = vpop.f32.mrb[26].mxu1 }
 0x758   :  { %v2608_v25 = vadd.f32 %v2604_v24, %v5922_v17  ;;  %v4215_v28 = vpop.f32.mrb[27].mxu1 }
 0x75b   :  { %v2768_v29 = vpop.f32.mrb[24].mxu0  ;;  %v2844_v30 = vpop.f32.mrb[28].mxu1 }
 0x75c   :  { %v2772_v31 = vadd.f32 %v2768_v29, %v2608_v25  ;;  %v4260_v34 = vpop.f32.mrb[29].mxu1  ;;  %4290 = vmatmul.mubr.msk.f32.vlgmr.msra.gmra.mrb[30].mxu1 %vm1054_vm9, %v2844_v30  ;;  %v4253_v35 = vpop.f32.mrb[25].mxu0 }
 0x82f   :  { %v2932_v27 = vpop.f32.mrb[30].mxu1 }
 0x830   :  { %v2936_v42 = vadd.f32 %v2932_v27, %v2772_v31  ;;  %v4291_v43 = vpop.f32.mrb[31].mxu1 }
 0x832   :  { %v2944_v44 = vadd.f32 %v3326_v41, %v2936_v42 }
 0x834   :  { %v2945_v45 = vmax.f32 %v2944_v44, 0.0 }
 0x836   :  { %4325 = vmatmul.mubr.f32.vlgmr.msra.gmra.mrb[26].mxu0 %v2945_v45 }
 0x909   :  { %v3035_v17 = vpop.f32.mrb[26].mxu0 }
 0x90a   :  { %v3036_v46 = vadd.f32 %v3327_v8, %v3035_v17  ;;  %v4326_v47 = vpop.f32.mrb[27].mxu0 }
 0x90c   :  { %v3039_v48 = vmax.f32 %v3036_v46, 0.0 }
 0x90e   :  { %3040 = vst [vmem:[#allocation2] sm:$0x3] %v3039_v48 }
 0x90f   :  { %4846 = shalt.err (!%p4843_p4)
}
 0x910   :  { %s4847_s4 = scalar_lea.hbm %s6071_s14, 32 }
 0x911   :  { %p4848_p5 = scmp.ne.s32.totalorder %s6071_s14, %s4847_s4  ;;  %p4851_p6 = scmp.lt.u32.totalorder %s4847_s4, %s6071_s14 }
 0x913   :  { %p4853_p7 = pnand %p4851_p6, %p4848_p5 }
 0x915   :  { %4856 = shalt.err (!%p4853_p7)
}
 0x916   :  { %3050 = dma.vmem_to_hbm [thread:$0]  %s3048_s18, 32, %s6071_s14, [#allocation3]  }
 0x917   :  { %4857 = dma.done.wait [#allocation3], 32  }
 0x918   :  { %4858 = vsyncadd [#allocation3], 4294967264 }
 0x919   :  { %3054 = vsyncpa [#allocation3], 1 }

</bundles_post_ra>
